<compile_context>
chip_gen: v6e
topology: v6e:2x2x1
jax: 0.10.0
libtpu: 0.0.40
codegen_flags: <defaults>
</compile_context>

<pallas_src>
import functools
import math

import jax
import jax.numpy as jnp
import numpy as np
from jax.experimental import pallas as pl
from jax.experimental.pallas import tpu as pltpu

_LANE = 128   # lane width; also per-gate block stride in the fused matmul
_OUTW = 256   # placement-matmul width: [output slab 0:128 | carry slab 128:256]


# ------------------------------ in-kernel math ------------------------------

def _layernorm(x, gamma, beta, eps=1e-5):
    # E[x^2] - mu^2 form: the two lane reductions are independent (shorter
    # serial chain than mean((x-mu)^2)).  Clamp for fp safety.
    mu = jnp.mean(x, axis=-1, keepdims=True)
    var = jnp.maximum(jnp.mean(x * x, axis=-1, keepdims=True) - mu * mu, 0.0)
    return (x - mu) * jax.lax.rsqrt(var + eps) * gamma + beta


def _ln_gru_cell(gi_raw, gh_raw, h, vec, H):
    """vec rows: [b_ih, b_hh, g_ih, bt_ih, g_hh, bt_hh, 0, 0] (width >= 3H)."""
    G = 3 * H
    v = vec[:, :G]
    gi = _layernorm(gi_raw + v[0:1], v[2:3], v[3:4])
    gh = _layernorm(gh_raw + v[1:2], v[4:5], v[5:6])
    s = jax.nn.sigmoid(gi + gh)           # one EUP push; r/z sliced from it
    r = s[:, :H]
    z = s[:, H:2 * H]
    n = jnp.tanh(gi[:, 2 * H:] + r * gh[:, 2 * H:])
    return (1.0 - z) * n + z * h


# --------------------------------- kernel -----------------------------------

def _kp_gru_prob_kernel(H, x_ref, init_ref, wx_ref, wh_ref, inner_ref, v_ref,
                        out_ref, carry_ref):
    t = pl.program_id(0)

    @pl.when(t == 0)
    def _():
        carry_ref[...] = init_ref[...]     # [h0 | h1 | h2 | pad]

    G = 3 * H
    BL = _LANE

    def dot(a, b):
        return jnp.dot(a, b, preferred_element_type=jnp.float32)

    x = x_ref[0]                           # (Bp, 128): [kp | dur | pad]
    h = carry_ref[...]                     # (Bp, 128): [h0 | h1 | h2 | pad]

    # All five activation-side projections in two block-diagonal matmuls;
    # each gate block lands at a 128-aligned column offset of `fused`.
    fused = dot(x, wx_ref[...]) + dot(h, wh_ref[...])        # (Bp, 5*128)

    gi0 = fused[:, 0 * BL:0 * BL + G]      # kp  @ W_ih(cell_cc)
    gh0 = fused[:, 1 * BL:1 * BL + G]      # h0  @ W_hh(cell_cc)
    gi1d = fused[:, 2 * BL:2 * BL + G]     # dur @ W_ih(cell_concat)[dur rows]
    gh1 = fused[:, 3 * BL:3 * BL + G]      # h1  @ W_hh(cell_concat)
    gh2 = fused[:, 4 * BL:4 * BL + G]      # h2  @ W_hh(cell_concat2)

    h0 = h[:, 0:H]
    h1 = h[:, H:2 * H]
    h2 = h[:, 2 * H:3 * H]

    # cell_cc(kp_label, h0)
    nh0 = _ln_gru_cell(gi0, gh0, h0, v_ref[0], H)

    # cell_concat(cat([nh0, duration]), h1): split-weight form (no concat).
    w2 = inner_ref[0:H, 0:BL]
    gi1 = gi1d + dot(nh0, w2)[:, :G]
    nh1 = _ln_gru_cell(gi1, gh1, h1, v_ref[1], H)

    # cell_concat2(nh1, h2)
    w5 = inner_ref[H:2 * H, 0:BL]
    gi2 = dot(nh1, w5)[:, :G]
    nh2 = _ln_gru_cell(gi2, gh2, h2, v_ref[2], H)

    # Output placement on the MXU (no epilogue concatenate):
    #   columns   0:128 -> [prob | dur | nh0 | nh1 | nh2 | 0]  (output slab)
    #   columns 128:256 -> [nh0 | nh1 | nh2 | 0]               (next carry)
    p0 = inner_ref[2 * H:3 * H, :]
    p1 = inner_ref[3 * H:4 * H, :]
    p2 = inner_ref[4 * H:5 * H, :]
    bias = inner_ref[5 * H:5 * H + 1, :]
    out2 = dot(nh0, p0) + dot(nh1, p1) + dot(nh2, p2) + bias   # (Bp, 256)

    out_ref[0] = out2[:, :BL]
    carry_ref[...] = out2[:, BL:]


# --------------------------------- wrappers ----------------------------------

def kp_gru_prob_decode(kp_labels, durations, hidden_states, packed):
    """Run the 3-cell GRU stack over T steps in ONE kernel launch.

    kp_labels: (T, B, C), durations: (T, B, D), hidden_states: 3 x (B, H).
    Returns per-step (prob (T,B,C), dur (T,B,D), [h0,h1,h2] each (T,B,H)).
    """
    T, B, C = kp_labels.shape
    D = durations.shape[-1]
    H = packed["hidden_size"]
    assert C == packed["cluster_n"] and D == packed["dur_dim"]
    Bp = pl.cdiv(B, 8) * 8                 # full (8,128) sublane tiles

    x = jnp.concatenate([kp_labels, durations], axis=-1)
    x = jnp.pad(x, ((0, 0), (0, Bp - B), (0, _LANE - (C + D))))
    init = jnp.concatenate(hidden_states, axis=1)
    init = jnp.pad(init, ((0, Bp - B), (0, _LANE - 3 * H)))

    wx, wh, inner, vslab = (packed["wx"], packed["wh"], packed["inner"],
                            packed["vslab"])
    kernel = functools.partial(_kp_gru_prob_kernel, H)

    out = pl.pallas_call(
        kernel,
        grid_spec=pltpu.PrefetchScalarGridSpec(
            num_scalar_prefetch=0,
            grid=(T,),
            in_specs=[
                pl.BlockSpec((1, Bp, _LANE), lambda t: (t, 0, 0)),   # per-step acts
                pl.BlockSpec((Bp, _LANE), lambda t: (0, 0)),         # initial hidden
                pl.BlockSpec(wx.shape, lambda t: (0, 0)),            # resident weights
                pl.BlockSpec(wh.shape, lambda t: (0, 0)),
                pl.BlockSpec(inner.shape, lambda t: (0, 0)),
                pl.BlockSpec(vslab.shape, lambda t: (0, 0, 0)),
            ],
            out_specs=pl.BlockSpec((1, Bp, _LANE), lambda t: (t, 0, 0)),
            scratch_shapes=[pltpu.VMEM((Bp, _LANE), jnp.float32)],
        ),
        out_shape=jax.ShapeDtypeStruct((T, Bp, _LANE), jnp.float32),
        compiler_params=pltpu.CompilerParams(
            dimension_semantics=("arbitrary",)),
    )(x, init, wx, wh, inner, vslab)

    out = out[:, :B]
    prob = out[..., :C]
    dur = out[..., C:C + D]
    nh0 = out[..., C + D:C + D + H]
    nh1 = out[..., C + D + H:C + D + 2 * H]
    nh2 = out[..., C + D + 2 * H:C + D + 3 * H]
    return prob, dur, [nh0, nh1, nh2]


def kp_gru_prob_forward(kp_label, duration, hidden_states, packed):
    """Single-step forward matching KP_GRU_Prob.forward:
    returns (None, prob, duration_out, new_hidden_states)."""
    prob, dur, hid = kp_gru_prob_decode(kp_label[None], duration[None],
                                        hidden_states, packed)
    return None, prob[0], dur[0], [h[0] for h in hid]


# ------------------------ parameters (PyTorch layout) ------------------------

def init_raw_params(key, cluster_n, hidden_size, dur_dim):
    """Synthetic params in PyTorch-like layout (w: [out, in], b/ln: [out])."""
    H, C, D = hidden_size, cluster_n, dur_dim

    def uni(k, shape, bound):
        return jax.random.uniform(k, shape, jnp.float32, -bound, bound)

    def gru_cell(k, in_dim):
        ks = jax.random.split(k, 4)
        bnd = 1.0 / math.sqrt(H)
        return dict(
            w_ih=uni(ks[0], (3 * H, in_dim), bnd),
            w_hh=uni(ks[1], (3 * H, H), bnd),
            b_ih=uni(ks[2], (3 * H,), bnd),
            b_hh=uni(ks[3], (3 * H,), bnd),
            g_ih=jnp.ones((3 * H,), jnp.float32),
            bt_ih=jnp.zeros((3 * H,), jnp.float32),
            g_hh=jnp.ones((3 * H,), jnp.float32),
            bt_hh=jnp.zeros((3 * H,), jnp.float32),
        )

    k_cc, k_cat, k_cat2, k1w, k1b, k2w, k2b = jax.random.split(key, 7)
    bnd_l = 1.0 / math.sqrt(H)
    return dict(
        cc=gru_cell(k_cc, C),
        concat=gru_cell(k_cat, H + D),
        concat2=gru_cell(k_cat2, H),
        lin1_w=uni(k1w, (C, H), bnd_l), lin1_b=uni(k1b, (C,), bnd_l),
        lin2_w=uni(k2w, (D, H), bnd_l), lin2_b=uni(k2b, (D,), bnd_l),
    )


def pack_params(raw, cluster_n, hidden_size, dur_dim):
    """Pack params once into the kernel's lane-aligned slab layout."""
    H, C, D = hidden_size, cluster_n, dur_dim
    G = 3 * H
    BL = _LANE
    cc, cat, cat2 = raw["cc"], raw["concat"], raw["concat2"]

    def A(v):
        return np.asarray(v, np.float32)

    cat_ih_t = A(cat["w_ih"]).T                    # (H + D, 3H)

    # Block-diagonal activation-side weight: x slab [kp | dur | pad] -> gates.
    wx = np.zeros((BL, 5 * BL), np.float32)
    wx[0:C, 0:G] = A(cc["w_ih"]).T                               # kp  -> gi0
    wx[C:C + D, 2 * BL:2 * BL + G] = cat_ih_t[H:]                # dur -> gi1

    # Block-diagonal hidden-side weight: carry slab [h0 | h1 | h2 | pad].
    wh = np.zeros((BL, 5 * BL), np.float32)
    wh[0:H, 1 * BL:1 * BL + G] = A(cc["w_hh"]).T                 # h0 -> gh0
    wh[H:2 * H, 3 * BL:3 * BL + G] = A(cat["w_hh"]).T            # h1 -> gh1
    wh[2 * H:3 * H, 4 * BL:4 * BL + G] = A(cat2["w_hh"]).T       # h2 -> gh2

    # In-step weights + output/carry placement matrices (one slab).
    eye = np.eye(H, dtype=np.float32)
    l1 = A(raw["lin1_w"]).T                        # (H, C)
    l2 = A(raw["lin2_w"]).T                        # (H, D)

    w2 = np.zeros((H, _OUTW), np.float32)
    w2[:, 0:G] = cat_ih_t[:H]                      # nh0 part of cell_concat ih
    w5 = np.zeros((H, _OUTW), np.float32)
    w5[:, 0:G] = A(cat2["w_ih"]).T                 # cell_concat2 ih

    p0 = np.zeros((H, _OUTW), np.float32)
    p0[:, C + D:C + D + H] = eye                   # place nh0 in output slab
    p0[:, BL:BL + H] = eye                         # place nh0 in carry slab

    p1 = np.zeros((H, _OUTW), np.float32)
    p1[:, 0:C] = l1                                # nh1 -> prob head
    p1[:, C:C + D] = l2                            # nh1 -> dur head
    p1[:, C + D + H:C + D + 2 * H] = eye
    p1[:, BL + H:BL + 2 * H] = eye

    p2 = np.zeros((H, _OUTW), np.float32)
    p2[:, 0:C] = l1                                # nh2 -> prob head
    p2[:, C:C + D] = l2                            # nh2 -> dur head
    p2[:, C + D + 2 * H:C + D + 3 * H] = eye
    p2[:, BL + 2 * H:BL + 3 * H] = eye

    bias = np.zeros((1, _OUTW), np.float32)
    bias[0, 0:C] = A(raw["lin1_b"])
    bias[0, C:C + D] = A(raw["lin2_b"])

    rows = np.concatenate([w2, w5, p0, p1, p2, bias], axis=0)    # (5H+1, 256)
    R = pl.cdiv(rows.shape[0], 8) * 8
    inner = np.zeros((R, _OUTW), np.float32)
    inner[:rows.shape[0]] = rows

    def vec_block(c):
        v = np.zeros((8, BL), np.float32)
        v[0, :G] = A(c["b_ih"]); v[1, :G] = A(c["b_hh"])
        v[2, :G] = A(c["g_ih"]); v[3, :G] = A(c["bt_ih"])
        v[4, :G] = A(c["g_hh"]); v[5, :G] = A(c["bt_hh"])
        return v

    vslab = np.stack([vec_block(cc), vec_block(cat), vec_block(cat2)], axis=0)

    return dict(hidden_size=H, cluster_n=C, dur_dim=D,
                wx=jnp.asarray(wx), wh=jnp.asarray(wh),
                inner=jnp.asarray(inner), vslab=jnp.asarray(vslab))


# --------------------------- pure-JAX reference ------------------------------

def _ref_ln(x, gamma, beta, eps=1e-5):
    mu = jnp.mean(x, axis=-1, keepdims=True)
    var = jnp.mean((x - mu) ** 2, axis=-1, keepdims=True)
    return (x - mu) * jax.lax.rsqrt(var + eps) * gamma + beta


def _ref_cell(x, h, c, H):
    gi = _ref_ln(x @ c["w_ih"].T + c["b_ih"], c["g_ih"], c["bt_ih"])
    gh = _ref_ln(h @ c["w_hh"].T + c["b_hh"], c["g_hh"], c["bt_hh"])
    r = jax.nn.sigmoid(gi[:, :H] + gh[:, :H])
    z = jax.nn.sigmoid(gi[:, H:2 * H] + gh[:, H:2 * H])
    n = jnp.tanh(gi[:, 2 * H:] + r * gh[:, 2 * H:])
    return (1.0 - z) * n + z * h


def reference_forward(kp_label, duration, hidden, raw, H):
    h0 = _ref_cell(kp_label, hidden[0], raw["cc"], H)
    x1 = jnp.concatenate([h0, duration], axis=1)
    h1 = _ref_cell(x1, hidden[1], raw["concat"], H)
    h2 = _ref_cell(h1, hidden[2], raw["concat2"], H)
    s = h1 + h2
    prob = s @ raw["lin1_w"].T + raw["lin1_b"]
    dur = s @ raw["lin2_w"].T + raw["lin2_b"]
    return prob, dur, [h0, h1, h2]


# ----------------------------------- main ------------------------------------

if __name__ == "__main__":
    B, CLUSTER_N, HIDDEN, DUR_DIM, T = 2, 16, 32, 8, 6

    key = jax.random.PRNGKey(0)
    (k_par, k_lab, k_dur, kh0, kh1, kh2,
     k_seq1, k_seq2) = jax.random.split(key, 8)

    raw = init_raw_params(k_par, CLUSTER_N, HIDDEN, DUR_DIM)
    packed = pack_params(raw, CLUSTER_N, HIDDEN, DUR_DIM)

    # kp_input = (_, kp_label, _, duration)
    kp_label = jax.random.normal(k_lab, (B, CLUSTER_N), jnp.float32)
    duration = jax.random.normal(k_dur, (B, DUR_DIM), jnp.float32)
    hidden_states = [
        jax.random.normal(kh0, (B, HIDDEN), jnp.float32),
        jax.random.normal(kh1, (B, HIDDEN), jnp.float32),
        jax.random.normal(kh2, (B, HIDDEN), jnp.float32),
    ]

    # ---- single-step forward (matches KP_GRU_Prob.forward) ----
    _, prob, dur_out, new_hidden = kp_gru_prob_forward(
        kp_label, duration, hidden_states, packed)
    jax.block_until_ready((prob, dur_out, new_hidden))

    assert prob.shape == (B, CLUSTER_N)
    assert dur_out.shape == (B, DUR_DIM)
    assert all(h.shape == (B, HIDDEN) for h in new_hidden)

    p_ref, d_ref, h_ref = reference_forward(kp_label, duration, hidden_states,
                                            raw, HIDDEN)
    np.testing.assert_allclose(np.asarray(prob), np.asarray(p_ref),
                               rtol=5e-2, atol=5e-2)
    np.testing.assert_allclose(np.asarray(dur_out), np.asarray(d_ref),
                               rtol=5e-2, atol=5e-2)
    for a, b in zip(new_hidden, h_ref):
        np.testing.assert_allclose(np.asarray(a), np.asarray(b),
                                   rtol=5e-2, atol=5e-2)

    # ---- multi-step decode: one launch, weights resident across T steps ----
    kp_seq = jax.random.normal(k_seq1, (T, B, CLUSTER_N), jnp.float32)
    dur_seq = jax.random.normal(k_seq2, (T, B, DUR_DIM), jnp.float32)
    probs, durs, hids = kp_gru_prob_decode(kp_seq, dur_seq, hidden_states,
                                           packed)
    jax.block_until_ready((probs, durs, hids))

    h = hidden_states
    for t in range(T):
        p_r, d_r, h = reference_forward(kp_seq[t], dur_seq[t], h, raw, HIDDEN)
        np.testing.assert_allclose(np.asarray(probs[t]), np.asarray(p_r),
                                   rtol=1e-1, atol=1e-1)
        np.testing.assert_allclose(np.asarray(durs[t]), np.asarray(d_r),
                                   rtol=1e-1, atol=1e-1)
        for a, b in zip([hids[0][t], hids[1][t], hids[2][t]], h):
            np.testing.assert_allclose(np.asarray(a), np.asarray(b),
                                       rtol=1e-1, atol=1e-1)

    print("KERNEL_OK")
</pallas_src>

<mosaic_0001>
module attributes {stable_mosaic.version = 11 : i64} {
  func.func @_kp_gru_prob_kernel(%arg0: i32, %arg1: memref<1x8x128xf32, #tpu.memory_space<vmem>>, %arg2: memref<8x128xf32, #tpu.memory_space<vmem>>, %arg3: memref<128x640xf32, #tpu.memory_space<vmem>>, %arg4: memref<128x640xf32, #tpu.memory_space<vmem>>, %arg5: memref<168x256xf32, #tpu.memory_space<vmem>>, %arg6: memref<3x8x128xf32, #tpu.memory_space<vmem>>, %arg7: memref<1x8x128xf32, #tpu.memory_space<vmem>>, %arg8: memref<8x128xf32, #tpu.memory_space<vmem>>) attributes {dimension_semantics = [#tpu.dimension_semantics<arbitrary>], iteration_bounds = array<i64: 1>, scalar_prefetch = 0 : i64, scratch_operands = 1 : i64, tpu.core_type = #tpu.core_type<tc>, window_params = [{transform_indices = @transform_0, window_bounds = array<i64: 1, 8, 128>}, {pipeline_mode = #tpu.pipeline_mode<synchronous>, transform_indices = @transform_1, window_bounds = array<i64: 8, 128>}, {pipeline_mode = #tpu.pipeline_mode<synchronous>, transform_indices = @transform_2, window_bounds = array<i64: 128, 640>}, {pipeline_mode = #tpu.pipeline_mode<synchronous>, transform_indices = @transform_3, window_bounds = array<i64: 128, 640>}, {pipeline_mode = #tpu.pipeline_mode<synchronous>, transform_indices = @transform_4, window_bounds = array<i64: 168, 256>}, {pipeline_mode = #tpu.pipeline_mode<synchronous>, transform_indices = @transform_5, window_bounds = array<i64: 3, 8, 128>}, {transform_indices = @transform_6, window_bounds = array<i64: 1, 8, 128>}]} {
    %c0_i32 = arith.constant 0 : i32
    %0 = arith.cmpi eq, %arg0, %c0_i32 : i32
    %1 = arith.extui %0 : i1 to i32
    %c0_i32_0 = arith.constant 0 : i32
    %2 = arith.cmpi ne, %1, %c0_i32_0 : i32
    scf.if %2 {
      %c0_76 = arith.constant 0 : index
      %c0_77 = arith.constant 0 : index
      %280 = vector.load %arg2[%c0_76, %c0_77] : memref<8x128xf32, #tpu.memory_space<vmem>>, vector<8x128xf32>
      %c0_78 = arith.constant 0 : index
      %c0_79 = arith.constant 0 : index
      %281 = vector.load %arg8[%c0_78, %c0_79] : memref<8x128xf32, #tpu.memory_space<vmem>>, vector<8x128xf32>
      tpu.vector_store %arg8[%c0_78, %c0_79], %280 {strides = array<i32>} : memref<8x128xf32, #tpu.memory_space<vmem>>, vector<8x128xf32>,
    } else {
    }
    %c0 = arith.constant 0 : index
    %c0_1 = arith.constant 0 : index
    %c0_2 = arith.constant 0 : index
    %3 = vector.load %arg1[%c0, %c0_1, %c0_2] : memref<1x8x128xf32, #tpu.memory_space<vmem>>, vector<1x8x128xf32>
    %4 = vector.shape_cast %3 : vector<1x8x128xf32> to vector<8x128xf32>
    %c0_3 = arith.constant 0 : index
    %c0_4 = arith.constant 0 : index
    %5 = vector.load %arg8[%c0_3, %c0_4] : memref<8x128xf32, #tpu.memory_space<vmem>>, vector<8x128xf32>
    %c0_5 = arith.constant 0 : index
    %c0_6 = arith.constant 0 : index
    %6 = vector.load %arg3[%c0_5, %c0_6] : memref<128x640xf32, #tpu.memory_space<vmem>>, vector<128x640xf32>
    %cst = arith.constant dense<0.000000e+00> : vector<8x640xf32>
    %7 = tpu.matmul %4, %6, %cst {dimension_numbers = #tpu.dot_dimension_numbers<[1], [0], [0], [1], [0, 0, 1, 1], [], []>} : vector<8x128xf32>, vector<128x640xf32>, vector<8x640xf32> -> vector<8x640xf32>
    %c0_7 = arith.constant 0 : index
    %c0_8 = arith.constant 0 : index
    %8 = vector.load %arg4[%c0_7, %c0_8] : memref<128x640xf32, #tpu.memory_space<vmem>>, vector<128x640xf32>
    %cst_9 = arith.constant dense<0.000000e+00> : vector<8x640xf32>
    %9 = tpu.matmul %5, %8, %cst_9 {dimension_numbers = #tpu.dot_dimension_numbers<[1], [0], [0], [1], [0, 0, 1, 1], [], []>} : vector<8x128xf32>, vector<128x640xf32>, vector<8x640xf32> -> vector<8x640xf32>
    %10 = arith.addf %7, %9 : vector<8x640xf32>
    %11 = vector.extract_strided_slice %10 {offsets = [0, 0], sizes = [8, 96], strides = [1, 1]} : vector<8x640xf32> to vector<8x96xf32>
    %12 = vector.extract_strided_slice %10 {offsets = [0, 128], sizes = [8, 96], strides = [1, 1]} : vector<8x640xf32> to vector<8x96xf32>
    %13 = vector.extract_strided_slice %10 {offsets = [0, 256], sizes = [8, 96], strides = [1, 1]} : vector<8x640xf32> to vector<8x96xf32>
    %14 = vector.extract_strided_slice %10 {offsets = [0, 384], sizes = [8, 96], strides = [1, 1]} : vector<8x640xf32> to vector<8x96xf32>
    %15 = vector.extract_strided_slice %10 {offsets = [0, 512], sizes = [8, 96], strides = [1, 1]} : vector<8x640xf32> to vector<8x96xf32>
    %16 = vector.extract_strided_slice %5 {offsets = [0, 0], sizes = [8, 32], strides = [1, 1]} : vector<8x128xf32> to vector<8x32xf32>
    %17 = vector.extract_strided_slice %5 {offsets = [0, 32], sizes = [8, 32], strides = [1, 1]} : vector<8x128xf32> to vector<8x32xf32>
    %18 = vector.extract_strided_slice %5 {offsets = [0, 64], sizes = [8, 32], strides = [1, 1]} : vector<8x128xf32> to vector<8x32xf32>
    %c0_10 = arith.constant 0 : index
    %c0_11 = arith.constant 0 : index
    %c0_12 = arith.constant 0 : index
    %19 = vector.load %arg6[%c0_10, %c0_11, %c0_12] : memref<3x8x128xf32, #tpu.memory_space<vmem>>, vector<1x8x128xf32>
    %20 = vector.shape_cast %19 : vector<1x8x128xf32> to vector<8x128xf32>
    %21 = vector.extract_strided_slice %20 {offsets = [0, 0], sizes = [8, 96], strides = [1, 1]} : vector<8x128xf32> to vector<8x96xf32>
    %22 = vector.extract_strided_slice %21 {offsets = [0, 0], sizes = [1, 96], strides = [1, 1]} : vector<8x96xf32> to vector<1x96xf32>
    %23 = vector.broadcast %22 : vector<1x96xf32> to vector<8x96xf32>
    %24 = arith.addf %11, %23 : vector<8x96xf32>
    %25 = vector.extract_strided_slice %21 {offsets = [2, 0], sizes = [1, 96], strides = [1, 1]} : vector<8x96xf32> to vector<1x96xf32>
    %26 = vector.extract_strided_slice %21 {offsets = [3, 0], sizes = [1, 96], strides = [1, 1]} : vector<8x96xf32> to vector<1x96xf32>
    %cst_13 = arith.constant dense<0.000000e+00> : vector<8xf32>
    %27 = vector.multi_reduction <add>, %24, %cst_13 [1] : vector<8x96xf32> to vector<8xf32>
    %28 = vector.shape_cast %27 : vector<8xf32> to vector<8x1xf32>
    %cst_14 = arith.constant 9.600000e+01 : f32
    %29 = vector.broadcast %cst_14 : f32 to vector<8x1xf32>
    %30 = arith.divf %28, %29 : vector<8x1xf32>
    %31 = arith.mulf %24, %24 : vector<8x96xf32>
    %cst_15 = arith.constant dense<0.000000e+00> : vector<8xf32>
    %32 = vector.multi_reduction <add>, %31, %cst_15 [1] : vector<8x96xf32> to vector<8xf32>
    %33 = vector.shape_cast %32 : vector<8xf32> to vector<8x1xf32>
    %cst_16 = arith.constant 9.600000e+01 : f32
    %34 = vector.broadcast %cst_16 : f32 to vector<8x1xf32>
    %35 = arith.divf %33, %34 : vector<8x1xf32>
    %36 = arith.mulf %30, %30 : vector<8x1xf32>
    %37 = arith.subf %35, %36 : vector<8x1xf32>
    %cst_17 = arith.constant 0.000000e+00 : f32
    %38 = vector.broadcast %cst_17 : f32 to vector<8x1xf32>
    %39 = arith.maximumf %37, %38 : vector<8x1xf32>
    %40 = vector.broadcast %30 : vector<8x1xf32> to vector<8x96xf32>
    %41 = arith.subf %24, %40 : vector<8x96xf32>
    %cst_18 = arith.constant 9.99999974E-6 : f32
    %42 = vector.broadcast %cst_18 : f32 to vector<8x1xf32>
    %43 = arith.addf %39, %42 : vector<8x1xf32>
    %44 = math.rsqrt %43 : vector<8x1xf32>
    %45 = vector.broadcast %44 : vector<8x1xf32> to vector<8x96xf32>
    %46 = arith.mulf %41, %45 : vector<8x96xf32>
    %47 = vector.broadcast %25 : vector<1x96xf32> to vector<8x96xf32>
    %48 = arith.mulf %46, %47 : vector<8x96xf32>
    %49 = vector.broadcast %26 : vector<1x96xf32> to vector<8x96xf32>
    %50 = arith.addf %48, %49 : vector<8x96xf32>
    %51 = vector.extract_strided_slice %21 {offsets = [1, 0], sizes = [1, 96], strides = [1, 1]} : vector<8x96xf32> to vector<1x96xf32>
    %52 = vector.broadcast %51 : vector<1x96xf32> to vector<8x96xf32>
    %53 = arith.addf %12, %52 : vector<8x96xf32>
    %54 = vector.extract_strided_slice %21 {offsets = [4, 0], sizes = [1, 96], strides = [1, 1]} : vector<8x96xf32> to vector<1x96xf32>
    %55 = vector.extract_strided_slice %21 {offsets = [5, 0], sizes = [1, 96], strides = [1, 1]} : vector<8x96xf32> to vector<1x96xf32>
    %cst_19 = arith.constant dense<0.000000e+00> : vector<8xf32>
    %56 = vector.multi_reduction <add>, %53, %cst_19 [1] : vector<8x96xf32> to vector<8xf32>
    %57 = vector.shape_cast %56 : vector<8xf32> to vector<8x1xf32>
    %cst_20 = arith.constant 9.600000e+01 : f32
    %58 = vector.broadcast %cst_20 : f32 to vector<8x1xf32>
    %59 = arith.divf %57, %58 : vector<8x1xf32>
    %60 = arith.mulf %53, %53 : vector<8x96xf32>
    %cst_21 = arith.constant dense<0.000000e+00> : vector<8xf32>
    %61 = vector.multi_reduction <add>, %60, %cst_21 [1] : vector<8x96xf32> to vector<8xf32>
    %62 = vector.shape_cast %61 : vector<8xf32> to vector<8x1xf32>
    %cst_22 = arith.constant 9.600000e+01 : f32
    %63 = vector.broadcast %cst_22 : f32 to vector<8x1xf32>
    %64 = arith.divf %62, %63 : vector<8x1xf32>
    %65 = arith.mulf %59, %59 : vector<8x1xf32>
    %66 = arith.subf %64, %65 : vector<8x1xf32>
    %cst_23 = arith.constant 0.000000e+00 : f32
    %67 = vector.broadcast %cst_23 : f32 to vector<8x1xf32>
    %68 = arith.maximumf %66, %67 : vector<8x1xf32>
    %69 = vector.broadcast %59 : vector<8x1xf32> to vector<8x96xf32>
    %70 = arith.subf %53, %69 : vector<8x96xf32>
    %cst_24 = arith.constant 9.99999974E-6 : f32
    %71 = vector.broadcast %cst_24 : f32 to vector<8x1xf32>
    %72 = arith.addf %68, %71 : vector<8x1xf32>
    %73 = math.rsqrt %72 : vector<8x1xf32>
    %74 = vector.broadcast %73 : vector<8x1xf32> to vector<8x96xf32>
    %75 = arith.mulf %70, %74 : vector<8x96xf32>
    %76 = vector.broadcast %54 : vector<1x96xf32> to vector<8x96xf32>
    %77 = arith.mulf %75, %76 : vector<8x96xf32>
    %78 = vector.broadcast %55 : vector<1x96xf32> to vector<8x96xf32>
    %79 = arith.addf %77, %78 : vector<8x96xf32>
    %80 = arith.addf %50, %79 : vector<8x96xf32>
    %81 = arith.negf %80 : vector<8x96xf32>
    %82 = math.exp %81 : vector<8x96xf32>
    %cst_25 = arith.constant 1.000000e+00 : f32
    %83 = vector.broadcast %cst_25 : f32 to vector<8x96xf32>
    %84 = arith.addf %83, %82 : vector<8x96xf32>
    %85 = arith.divf %83, %84 : vector<8x96xf32>
    %86 = vector.extract_strided_slice %85 {offsets = [0, 0], sizes = [8, 32], strides = [1, 1]} : vector<8x96xf32> to vector<8x32xf32>
    %87 = vector.extract_strided_slice %85 {offsets = [0, 32], sizes = [8, 32], strides = [1, 1]} : vector<8x96xf32> to vector<8x32xf32>
    %88 = vector.extract_strided_slice %50 {offsets = [0, 64], sizes = [8, 32], strides = [1, 1]} : vector<8x96xf32> to vector<8x32xf32>
    %89 = vector.extract_strided_slice %79 {offsets = [0, 64], sizes = [8, 32], strides = [1, 1]} : vector<8x96xf32> to vector<8x32xf32>
    %90 = arith.mulf %86, %89 : vector<8x32xf32>
    %91 = arith.addf %88, %90 : vector<8x32xf32>
    %92 = math.tanh %91 : vector<8x32xf32>
    %cst_26 = arith.constant 1.000000e+00 : f32
    %93 = vector.broadcast %cst_26 : f32 to vector<8x32xf32>
    %94 = arith.subf %93, %87 : vector<8x32xf32>
    %95 = arith.mulf %94, %92 : vector<8x32xf32>
    %96 = arith.mulf %87, %16 : vector<8x32xf32>
    %97 = arith.addf %95, %96 : vector<8x32xf32>
    %c0_27 = arith.constant 0 : index
    %c0_28 = arith.constant 0 : index
    %98 = vector.load %arg5[%c0_27, %c0_28] : memref<168x256xf32, #tpu.memory_space<vmem>>, vector<32x128xf32>
    %cst_29 = arith.constant dense<0.000000e+00> : vector<8x128xf32>
    %99 = tpu.matmul %97, %98, %cst_29 {dimension_numbers = #tpu.dot_dimension_numbers<[1], [0], [0], [1], [0, 0, 1, 1], [], []>} : vector<8x32xf32>, vector<32x128xf32>, vector<8x128xf32> -> vector<8x128xf32>
    %100 = vector.extract_strided_slice %99 {offsets = [0, 0], sizes = [8, 96], strides = [1, 1]} : vector<8x128xf32> to vector<8x96xf32>
    %101 = arith.addf %13, %100 : vector<8x96xf32>
    %c1 = arith.constant 1 : index
    %c0_30 = arith.constant 0 : index
    %c0_31 = arith.constant 0 : index
    %102 = vector.load %arg6[%c1, %c0_30, %c0_31] : memref<3x8x128xf32, #tpu.memory_space<vmem>>, vector<1x8x128xf32>
    %103 = vector.shape_cast %102 : vector<1x8x128xf32> to vector<8x128xf32>
    %104 = vector.extract_strided_slice %103 {offsets = [0, 0], sizes = [8, 96], strides = [1, 1]} : vector<8x128xf32> to vector<8x96xf32>
    %105 = vector.extract_strided_slice %104 {offsets = [0, 0], sizes = [1, 96], strides = [1, 1]} : vector<8x96xf32> to vector<1x96xf32>
    %106 = vector.broadcast %105 : vector<1x96xf32> to vector<8x96xf32>
    %107 = arith.addf %101, %106 : vector<8x96xf32>
    %108 = vector.extract_strided_slice %104 {offsets = [2, 0], sizes = [1, 96], strides = [1, 1]} : vector<8x96xf32> to vector<1x96xf32>
    %109 = vector.extract_strided_slice %104 {offsets = [3, 0], sizes = [1, 96], strides = [1, 1]} : vector<8x96xf32> to vector<1x96xf32>
    %cst_32 = arith.constant dense<0.000000e+00> : vector<8xf32>
    %110 = vector.multi_reduction <add>, %107, %cst_32 [1] : vector<8x96xf32> to vector<8xf32>
    %111 = vector.shape_cast %110 : vector<8xf32> to vector<8x1xf32>
    %cst_33 = arith.constant 9.600000e+01 : f32
    %112 = vector.broadcast %cst_33 : f32 to vector<8x1xf32>
    %113 = arith.divf %111, %112 : vector<8x1xf32>
    %114 = arith.mulf %107, %107 : vector<8x96xf32>
    %cst_34 = arith.constant dense<0.000000e+00> : vector<8xf32>
    %115 = vector.multi_reduction <add>, %114, %cst_34 [1] : vector<8x96xf32> to vector<8xf32>
    %116 = vector.shape_cast %115 : vector<8xf32> to vector<8x1xf32>
    %cst_35 = arith.constant 9.600000e+01 : f32
    %117 = vector.broadcast %cst_35 : f32 to vector<8x1xf32>
    %118 = arith.divf %116, %117 : vector<8x1xf32>
    %119 = arith.mulf %113, %113 : vector<8x1xf32>
    %120 = arith.subf %118, %119 : vector<8x1xf32>
    %cst_36 = arith.constant 0.000000e+00 : f32
    %121 = vector.broadcast %cst_36 : f32 to vector<8x1xf32>
    %122 = arith.maximumf %120, %121 : vector<8x1xf32>
    %123 = vector.broadcast %113 : vector<8x1xf32> to vector<8x96xf32>
    %124 = arith.subf %107, %123 : vector<8x96xf32>
    %cst_37 = arith.constant 9.99999974E-6 : f32
    %125 = vector.broadcast %cst_37 : f32 to vector<8x1xf32>
    %126 = arith.addf %122, %125 : vector<8x1xf32>
    %127 = math.rsqrt %126 : vector<8x1xf32>
    %128 = vector.broadcast %127 : vector<8x1xf32> to vector<8x96xf32>
    %129 = arith.mulf %124, %128 : vector<8x96xf32>
    %130 = vector.broadcast %108 : vector<1x96xf32> to vector<8x96xf32>
    %131 = arith.mulf %129, %130 : vector<8x96xf32>
    %132 = vector.broadcast %109 : vector<1x96xf32> to vector<8x96xf32>
    %133 = arith.addf %131, %132 : vector<8x96xf32>
    %134 = vector.extract_strided_slice %104 {offsets = [1, 0], sizes = [1, 96], strides = [1, 1]} : vector<8x96xf32> to vector<1x96xf32>
    %135 = vector.broadcast %134 : vector<1x96xf32> to vector<8x96xf32>
    %136 = arith.addf %14, %135 : vector<8x96xf32>
    %137 = vector.extract_strided_slice %104 {offsets = [4, 0], sizes = [1, 96], strides = [1, 1]} : vector<8x96xf32> to vector<1x96xf32>
    %138 = vector.extract_strided_slice %104 {offsets = [5, 0], sizes = [1, 96], strides = [1, 1]} : vector<8x96xf32> to vector<1x96xf32>
    %cst_38 = arith.constant dense<0.000000e+00> : vector<8xf32>
    %139 = vector.multi_reduction <add>, %136, %cst_38 [1] : vector<8x96xf32> to vector<8xf32>
    %140 = vector.shape_cast %139 : vector<8xf32> to vector<8x1xf32>
    %cst_39 = arith.constant 9.600000e+01 : f32
    %141 = vector.broadcast %cst_39 : f32 to vector<8x1xf32>
    %142 = arith.divf %140, %141 : vector<8x1xf32>
    %143 = arith.mulf %136, %136 : vector<8x96xf32>
    %cst_40 = arith.constant dense<0.000000e+00> : vector<8xf32>
    %144 = vector.multi_reduction <add>, %143, %cst_40 [1] : vector<8x96xf32> to vector<8xf32>
    %145 = vector.shape_cast %144 : vector<8xf32> to vector<8x1xf32>
    %cst_41 = arith.constant 9.600000e+01 : f32
    %146 = vector.broadcast %cst_41 : f32 to vector<8x1xf32>
    %147 = arith.divf %145, %146 : vector<8x1xf32>
    %148 = arith.mulf %142, %142 : vector<8x1xf32>
    %149 = arith.subf %147, %148 : vector<8x1xf32>
    %cst_42 = arith.constant 0.000000e+00 : f32
    %150 = vector.broadcast %cst_42 : f32 to vector<8x1xf32>
    %151 = arith.maximumf %149, %150 : vector<8x1xf32>
    %152 = vector.broadcast %142 : vector<8x1xf32> to vector<8x96xf32>
    %153 = arith.subf %136, %152 : vector<8x96xf32>
    %cst_43 = arith.constant 9.99999974E-6 : f32
    %154 = vector.broadcast %cst_43 : f32 to vector<8x1xf32>
    %155 = arith.addf %151, %154 : vector<8x1xf32>
    %156 = math.rsqrt %155 : vector<8x1xf32>
    %157 = vector.broadcast %156 : vector<8x1xf32> to vector<8x96xf32>
    %158 = arith.mulf %153, %157 : vector<8x96xf32>
    %159 = vector.broadcast %137 : vector<1x96xf32> to vector<8x96xf32>
    %160 = arith.mulf %158, %159 : vector<8x96xf32>
    %161 = vector.broadcast %138 : vector<1x96xf32> to vector<8x96xf32>
    %162 = arith.addf %160, %161 : vector<8x96xf32>
    %163 = arith.addf %133, %162 : vector<8x96xf32>
    %164 = arith.negf %163 : vector<8x96xf32>
    %165 = math.exp %164 : vector<8x96xf32>
    %cst_44 = arith.constant 1.000000e+00 : f32
    %166 = vector.broadcast %cst_44 : f32 to vector<8x96xf32>
    %167 = arith.addf %166, %165 : vector<8x96xf32>
    %168 = arith.divf %166, %167 : vector<8x96xf32>
    %169 = vector.extract_strided_slice %168 {offsets = [0, 0], sizes = [8, 32], strides = [1, 1]} : vector<8x96xf32> to vector<8x32xf32>
    %170 = vector.extract_strided_slice %168 {offsets = [0, 32], sizes = [8, 32], strides = [1, 1]} : vector<8x96xf32> to vector<8x32xf32>
    %171 = vector.extract_strided_slice %133 {offsets = [0, 64], sizes = [8, 32], strides = [1, 1]} : vector<8x96xf32> to vector<8x32xf32>
    %172 = vector.extract_strided_slice %162 {offsets = [0, 64], sizes = [8, 32], strides = [1, 1]} : vector<8x96xf32> to vector<8x32xf32>
    %173 = arith.mulf %169, %172 : vector<8x32xf32>
    %174 = arith.addf %171, %173 : vector<8x32xf32>
    %175 = math.tanh %174 : vector<8x32xf32>
    %cst_45 = arith.constant 1.000000e+00 : f32
    %176 = vector.broadcast %cst_45 : f32 to vector<8x32xf32>
    %177 = arith.subf %176, %170 : vector<8x32xf32>
    %178 = arith.mulf %177, %175 : vector<8x32xf32>
    %179 = arith.mulf %170, %17 : vector<8x32xf32>
    %180 = arith.addf %178, %179 : vector<8x32xf32>
    %c32 = arith.constant 32 : index
    %c0_46 = arith.constant 0 : index
    %181 = vector.load %arg5[%c32, %c0_46] : memref<168x256xf32, #tpu.memory_space<vmem>>, vector<32x128xf32>
    %cst_47 = arith.constant dense<0.000000e+00> : vector<8x128xf32>
    %182 = tpu.matmul %180, %181, %cst_47 {dimension_numbers = #tpu.dot_dimension_numbers<[1], [0], [0], [1], [0, 0, 1, 1], [], []>} : vector<8x32xf32>, vector<32x128xf32>, vector<8x128xf32> -> vector<8x128xf32>
    %183 = vector.extract_strided_slice %182 {offsets = [0, 0], sizes = [8, 96], strides = [1, 1]} : vector<8x128xf32> to vector<8x96xf32>
    %c2 = arith.constant 2 : index
    %c0_48 = arith.constant 0 : index
    %c0_49 = arith.constant 0 : index
    %184 = vector.load %arg6[%c2, %c0_48, %c0_49] : memref<3x8x128xf32, #tpu.memory_space<vmem>>, vector<1x8x128xf32>
    %185 = vector.shape_cast %184 : vector<1x8x128xf32> to vector<8x128xf32>
    %186 = vector.extract_strided_slice %185 {offsets = [0, 0], sizes = [8, 96], strides = [1, 1]} : vector<8x128xf32> to vector<8x96xf32>
    %187 = vector.extract_strided_slice %186 {offsets = [0, 0], sizes = [1, 96], strides = [1, 1]} : vector<8x96xf32> to vector<1x96xf32>
    %188 = vector.broadcast %187 : vector<1x96xf32> to vector<8x96xf32>
    %189 = arith.addf %183, %188 : vector<8x96xf32>
    %190 = vector.extract_strided_slice %186 {offsets = [2, 0], sizes = [1, 96], strides = [1, 1]} : vector<8x96xf32> to vector<1x96xf32>
    %191 = vector.extract_strided_slice %186 {offsets = [3, 0], sizes = [1, 96], strides = [1, 1]} : vector<8x96xf32> to vector<1x96xf32>
    %cst_50 = arith.constant dense<0.000000e+00> : vector<8xf32>
    %192 = vector.multi_reduction <add>, %189, %cst_50 [1] : vector<8x96xf32> to vector<8xf32>
    %193 = vector.shape_cast %192 : vector<8xf32> to vector<8x1xf32>
    %cst_51 = arith.constant 9.600000e+01 : f32
    %194 = vector.broadcast %cst_51 : f32 to vector<8x1xf32>
    %195 = arith.divf %193, %194 : vector<8x1xf32>
    %196 = arith.mulf %189, %189 : vector<8x96xf32>
    %cst_52 = arith.constant dense<0.000000e+00> : vector<8xf32>
    %197 = vector.multi_reduction <add>, %196, %cst_52 [1] : vector<8x96xf32> to vector<8xf32>
    %198 = vector.shape_cast %197 : vector<8xf32> to vector<8x1xf32>
    %cst_53 = arith.constant 9.600000e+01 : f32
    %199 = vector.broadcast %cst_53 : f32 to vector<8x1xf32>
    %200 = arith.divf %198, %199 : vector<8x1xf32>
    %201 = arith.mulf %195, %195 : vector<8x1xf32>
    %202 = arith.subf %200, %201 : vector<8x1xf32>
    %cst_54 = arith.constant 0.000000e+00 : f32
    %203 = vector.broadcast %cst_54 : f32 to vector<8x1xf32>
    %204 = arith.maximumf %202, %203 : vector<8x1xf32>
    %205 = vector.broadcast %195 : vector<8x1xf32> to vector<8x96xf32>
    %206 = arith.subf %189, %205 : vector<8x96xf32>
    %cst_55 = arith.constant 9.99999974E-6 : f32
    %207 = vector.broadcast %cst_55 : f32 to vector<8x1xf32>
    %208 = arith.addf %204, %207 : vector<8x1xf32>
    %209 = math.rsqrt %208 : vector<8x1xf32>
    %210 = vector.broadcast %209 : vector<8x1xf32> to vector<8x96xf32>
    %211 = arith.mulf %206, %210 : vector<8x96xf32>
    %212 = vector.broadcast %190 : vector<1x96xf32> to vector<8x96xf32>
    %213 = arith.mulf %211, %212 : vector<8x96xf32>
    %214 = vector.broadcast %191 : vector<1x96xf32> to vector<8x96xf32>
    %215 = arith.addf %213, %214 : vector<8x96xf32>
    %216 = vector.extract_strided_slice %186 {offsets = [1, 0], sizes = [1, 96], strides = [1, 1]} : vector<8x96xf32> to vector<1x96xf32>
    %217 = vector.broadcast %216 : vector<1x96xf32> to vector<8x96xf32>
    %218 = arith.addf %15, %217 : vector<8x96xf32>
    %219 = vector.extract_strided_slice %186 {offsets = [4, 0], sizes = [1, 96], strides = [1, 1]} : vector<8x96xf32> to vector<1x96xf32>
    %220 = vector.extract_strided_slice %186 {offsets = [5, 0], sizes = [1, 96], strides = [1, 1]} : vector<8x96xf32> to vector<1x96xf32>
    %cst_56 = arith.constant dense<0.000000e+00> : vector<8xf32>
    %221 = vector.multi_reduction <add>, %218, %cst_56 [1] : vector<8x96xf32> to vector<8xf32>
    %222 = vector.shape_cast %221 : vector<8xf32> to vector<8x1xf32>
    %cst_57 = arith.constant 9.600000e+01 : f32
    %223 = vector.broadcast %cst_57 : f32 to vector<8x1xf32>
    %224 = arith.divf %222, %223 : vector<8x1xf32>
    %225 = arith.mulf %218, %218 : vector<8x96xf32>
    %cst_58 = arith.constant dense<0.000000e+00> : vector<8xf32>
    %226 = vector.multi_reduction <add>, %225, %cst_58 [1] : vector<8x96xf32> to vector<8xf32>
    %227 = vector.shape_cast %226 : vector<8xf32> to vector<8x1xf32>
    %cst_59 = arith.constant 9.600000e+01 : f32
    %228 = vector.broadcast %cst_59 : f32 to vector<8x1xf32>
    %229 = arith.divf %227, %228 : vector<8x1xf32>
    %230 = arith.mulf %224, %224 : vector<8x1xf32>
    %231 = arith.subf %229, %230 : vector<8x1xf32>
    %cst_60 = arith.constant 0.000000e+00 : f32
    %232 = vector.broadcast %cst_60 : f32 to vector<8x1xf32>
    %233 = arith.maximumf %231, %232 : vector<8x1xf32>
    %234 = vector.broadcast %224 : vector<8x1xf32> to vector<8x96xf32>
    %235 = arith.subf %218, %234 : vector<8x96xf32>
    %cst_61 = arith.constant 9.99999974E-6 : f32
    %236 = vector.broadcast %cst_61 : f32 to vector<8x1xf32>
    %237 = arith.addf %233, %236 : vector<8x1xf32>
    %238 = math.rsqrt %237 : vector<8x1xf32>
    %239 = vector.broadcast %238 : vector<8x1xf32> to vector<8x96xf32>
    %240 = arith.mulf %235, %239 : vector<8x96xf32>
    %241 = vector.broadcast %219 : vector<1x96xf32> to vector<8x96xf32>
    %242 = arith.mulf %240, %241 : vector<8x96xf32>
    %243 = vector.broadcast %220 : vector<1x96xf32> to vector<8x96xf32>
    %244 = arith.addf %242, %243 : vector<8x96xf32>
    %245 = arith.addf %215, %244 : vector<8x96xf32>
    %246 = arith.negf %245 : vector<8x96xf32>
    %247 = math.exp %246 : vector<8x96xf32>
    %cst_62 = arith.constant 1.000000e+00 : f32
    %248 = vector.broadcast %cst_62 : f32 to vector<8x96xf32>
    %249 = arith.addf %248, %247 : vector<8x96xf32>
    %250 = arith.divf %248, %249 : vector<8x96xf32>
    %251 = vector.extract_strided_slice %250 {offsets = [0, 0], sizes = [8, 32], strides = [1, 1]} : vector<8x96xf32> to vector<8x32xf32>
    %252 = vector.extract_strided_slice %250 {offsets = [0, 32], sizes = [8, 32], strides = [1, 1]} : vector<8x96xf32> to vector<8x32xf32>
    %253 = vector.extract_strided_slice %215 {offsets = [0, 64], sizes = [8, 32], strides = [1, 1]} : vector<8x96xf32> to vector<8x32xf32>
    %254 = vector.extract_strided_slice %244 {offsets = [0, 64], sizes = [8, 32], strides = [1, 1]} : vector<8x96xf32> to vector<8x32xf32>
    %255 = arith.mulf %251, %254 : vector<8x32xf32>
    %256 = arith.addf %253, %255 : vector<8x32xf32>
    %257 = math.tanh %256 : vector<8x32xf32>
    %cst_63 = arith.constant 1.000000e+00 : f32
    %258 = vector.broadcast %cst_63 : f32 to vector<8x32xf32>
    %259 = arith.subf %258, %252 : vector<8x32xf32>
    %260 = arith.mulf %259, %257 : vector<8x32xf32>
    %261 = arith.mulf %252, %18 : vector<8x32xf32>
    %262 = arith.addf %260, %261 : vector<8x32xf32>
    %c64 = arith.constant 64 : index
    %c0_64 = arith.constant 0 : index
    %263 = vector.load %arg5[%c64, %c0_64] : memref<168x256xf32, #tpu.memory_space<vmem>>, vector<32x256xf32>
    %c96 = arith.constant 96 : index
    %c0_65 = arith.constant 0 : index
    %264 = vector.load %arg5[%c96, %c0_65] : memref<168x256xf32, #tpu.memory_space<vmem>>, vector<32x256xf32>
    %c128 = arith.constant 128 : index
    %c0_66 = arith.constant 0 : index
    %265 = vector.load %arg5[%c128, %c0_66] : memref<168x256xf32, #tpu.memory_space<vmem>>, vector<32x256xf32>
    %c160 = arith.constant 160 : index
    %c0_67 = arith.constant 0 : index
    %266 = vector.load %arg5[%c160, %c0_67] : memref<168x256xf32, #tpu.memory_space<vmem>>, vector<1x256xf32>
    %cst_68 = arith.constant dense<0.000000e+00> : vector<8x256xf32>
    %267 = tpu.matmul %97, %263, %cst_68 {dimension_numbers = #tpu.dot_dimension_numbers<[1], [0], [0], [1], [0, 0, 1, 1], [], []>} : vector<8x32xf32>, vector<32x256xf32>, vector<8x256xf32> -> vector<8x256xf32>
    %cst_69 = arith.constant dense<0.000000e+00> : vector<8x256xf32>
    %268 = tpu.matmul %180, %264, %cst_69 {dimension_numbers = #tpu.dot_dimension_numbers<[1], [0], [0], [1], [0, 0, 1, 1], [], []>} : vector<8x32xf32>, vector<32x256xf32>, vector<8x256xf32> -> vector<8x256xf32>
    %269 = arith.addf %267, %268 : vector<8x256xf32>
    %cst_70 = arith.constant dense<0.000000e+00> : vector<8x256xf32>
    %270 = tpu.matmul %262, %265, %cst_70 {dimension_numbers = #tpu.dot_dimension_numbers<[1], [0], [0], [1], [0, 0, 1, 1], [], []>} : vector<8x32xf32>, vector<32x256xf32>, vector<8x256xf32> -> vector<8x256xf32>
    %271 = arith.addf %269, %270 : vector<8x256xf32>
    %272 = vector.broadcast %266 : vector<1x256xf32> to vector<8x256xf32>
    %273 = arith.addf %271, %272 : vector<8x256xf32>
    %274 = vector.extract_strided_slice %273 {offsets = [0, 0], sizes = [8, 128], strides = [1, 1]} : vector<8x256xf32> to vector<8x128xf32>
    %c0_71 = arith.constant 0 : index
    %c0_72 = arith.constant 0 : index
    %c0_73 = arith.constant 0 : index
    %275 = vector.load %arg7[%c0_71, %c0_72, %c0_73] : memref<1x8x128xf32, #tpu.memory_space<vmem>>, vector<1x8x128xf32>
    %276 = vector.shape_cast %275 : vector<1x8x128xf32> to vector<8x128xf32>
    %277 = vector.shape_cast %274 : vector<8x128xf32> to vector<1x8x128xf32>
    tpu.vector_store %arg7[%c0_71, %c0_72, %c0_73], %277 {strides = array<i32>} : memref<1x8x128xf32, #tpu.memory_space<vmem>>, vector<1x8x128xf32>,
    %278 = vector.extract_strided_slice %273 {offsets = [0, 128], sizes = [8, 128], strides = [1, 1]} : vector<8x256xf32> to vector<8x128xf32>
    %c0_74 = arith.constant 0 : index
    %c0_75 = arith.constant 0 : index
    %279 = vector.load %arg8[%c0_74, %c0_75] : memref<8x128xf32, #tpu.memory_space<vmem>>, vector<8x128xf32>
    tpu.vector_store %arg8[%c0_74, %c0_75], %278 {strides = array<i32>} : memref<8x128xf32, #tpu.memory_space<vmem>>, vector<8x128xf32>,
    return
  }
  func.func @transform_0(%arg0: i32) -> (i32, i32, i32) {
    %c0_i32 = arith.constant 0 : i32
    %c0_i32_0 = arith.constant 0 : i32
    %c0_i32_1 = arith.constant 0 : i32
    return %arg0, %c0_i32, %c0_i32_0 : i32, i32, i32
  }
  func.func @transform_1(%arg0: i32) -> (i32, i32) {
    %c0_i32 = arith.constant 0 : i32
    %c0_i32_0 = arith.constant 0 : i32
    %c0_i32_1 = arith.constant 0 : i32
    return %c0_i32, %c0_i32_0 : i32, i32
  }
  func.func @transform_2(%arg0: i32) -> (i32, i32) {
    %c0_i32 = arith.constant 0 : i32
    %c0_i32_0 = arith.constant 0 : i32
    %c0_i32_1 = arith.constant 0 : i32
    return %c0_i32, %c0_i32_0 : i32, i32
  }
  func.func @transform_3(%arg0: i32) -> (i32, i32) {
    %c0_i32 = arith.constant 0 : i32
    %c0_i32_0 = arith.constant 0 : i32
    %c0_i32_1 = arith.constant 0 : i32
    return %c0_i32, %c0_i32_0 : i32, i32
  }
  func.func @transform_4(%arg0: i32) -> (i32, i32) {
    %c0_i32 = arith.constant 0 : i32
    %c0_i32_0 = arith.constant 0 : i32
    %c0_i32_1 = arith.constant 0 : i32
    return %c0_i32, %c0_i32_0 : i32, i32
  }
  func.func @transform_5(%arg0: i32) -> (i32, i32, i32) {
    %c0_i32 = arith.constant 0 : i32
    %c0_i32_0 = arith.constant 0 : i32
    %c0_i32_1 = arith.constant 0 : i32
    %c0_i32_2 = arith.constant 0 : i32
    return %c0_i32, %c0_i32_0, %c0_i32_1 : i32, i32, i32
  }
  func.func @transform_6(%arg0: i32) -> (i32, i32, i32) {
    %c0_i32 = arith.constant 0 : i32
    %c0_i32_0 = arith.constant 0 : i32
    %c0_i32_1 = arith.constant 0 : i32
    return %arg0, %c0_i32, %c0_i32_0 : i32, i32, i32
  }
}

</mosaic_0001>

<bundles_post_ra>
// kernel: tpu_custom_call.1
= control target key start
LH: loop header
LB: loop body
LE: loop exit
PB: predicated region body
PF: predicated region fallthrough
CT: control target
= control target key end

     0   :  { %11 = vsyncpa [#allocation4], 0  ;;  %s2015_s0 = inlined_call_operand.hbm [shape: f32[1,8,128], index: 0, kind: input, shape index: {}]   ;;  %s2016_s1 = inlined_call_operand.hbm [shape: f32[8,128], index: 1, kind: input, shape index: {}]   ;;  %s2017_s2 = inlined_call_operand.hbm [shape: f32[128,640], index: 2, kind: input, shape index: {}]   ;;  %s2018_s3 = inlined_call_operand.hbm [shape: f32[128,640], index: 3, kind: input, shape index: {}]   ;;  %s2019_s4 = inlined_call_operand.hbm [shape: f32[168,256], index: 4, kind: input, shape index: {}]   ;;  %s2020_s5 = inlined_call_operand.hbm [shape: f32[3,8,128], index: 5, kind: input, shape index: {}]   ;;  %s2021_s6 = inlined_call_operand.hbm [shape: f32[1,8,128], index: 6, kind: output, shape index: {}]  }
   0x1   :  { %12 = vsyncpa [#allocation7], 0 }
   0x2   :  { %13 = vsyncpa [#allocation10], 0 }
   0x3   :  { %14 = vsyncpa [#allocation13], 0 }
   0x4   :  { %15 = vsyncpa [#allocation5], 0  ;;  %s1754_s21 = smov [#allocation6]  }
   0x5   :  { %s32_s22 = sshll.u32 %s1754_s21, 4  ;;  %s33_s22 = int_to_ptr.vmem [resolvable:$true] %s32_s22 }
   0x6   :  { %s1612_s23 = scalar_lea.vmem %s33_s22, 128  ;;  %p1617_p1 = scmp.lt.s32.totalorder %s33_s22, %s33_s22 }
   0x7   :  { %p1613_p0 = scmp.ne.s32.totalorder %s33_s22, %s1612_s23  ;;  %p1618_p2 = scmp.lt.s32.totalorder %s1612_s23, %s1612_s23 }
   0x9   :  { %p1619_p3 = por %p1618_p2, %p1617_p1 }
   0xb   :  { %p1620_p4 = pnand %p1619_p3, %p1613_p0 }
   0xd   :  { %1623 = shalt.err (!%p1620_p4)
}
   0xe   :  { %35 = dma.hbm_to_vmem [thread:$0]  %s2016_s1, 128, %s33_s22, [#allocation7]  }
   0xf   :  { %s1755_s26 = smov [#allocation9]   ;;  %s1756_s28 = smov [#allocation3]  }
  0x10   :  { %s53_s27 = sshll.u32 %s1755_s26, 4  ;;  %s22_s29 = sshll.u32 %s1756_s28, 4  ;;  %s54_s27 = int_to_ptr.vmem [resolvable:$true] %s53_s27  ;;  %s23_s29 = int_to_ptr.vmem [resolvable:$true] %s22_s29 }
  0x11   :  { %s1632_s30 = scalar_lea.vmem %s54_s27, 10240  ;;  %p1637_p6 = scmp.lt.s32.totalorder %s54_s27, %s54_s27 }
  0x12   :  { %p1633_p5 = scmp.ne.s32.totalorder %s54_s27, %s1632_s30  ;;  %p1638_p7 = scmp.lt.s32.totalorder %s1632_s30, %s1632_s30 }
  0x14   :  { %p1639_p8 = por %p1638_p7, %p1637_p6 }
  0x16   :  { %p1640_p9 = pnand %p1639_p8, %p1633_p5 }
  0x18   :  { %1643 = shalt.err (!%p1640_p9)
}
  0x19   :  { %s1757_s7 = smov 640   ;;  %s1758_s8 = smov 40  }
  0x1a   :  { %59 = dma.hbm_to_vmem [thread:$0]  %s2018_s3, 10240, %s54_s27, [#allocation10], %s1757_s7, %s1757_s7, %s1758_s8  }
  0x1b   :  { %s1652_s1 = scalar_lea.vmem %s23_s29, 128  ;;  %p1657_p11 = scmp.lt.s32.totalorder %s23_s29, %s23_s29 }
  0x1c   :  { %p1653_p10 = scmp.ne.s32.totalorder %s23_s29, %s1652_s1  ;;  %p1658_p12 = scmp.lt.s32.totalorder %s1652_s1, %s1652_s1 }
  0x1e   :  { %p1659_p13 = por %p1658_p12, %p1657_p11 }
  0x20   :  { %p1660_p0 = pnand %p1659_p13, %p1653_p10 }
  0x22   :  { %1663 = shalt.err (!%p1660_p0)
}
  0x23   :  { %25 = dma.hbm_to_vmem [thread:$0]  %s2015_s0, 128, %s23_s29, [#allocation4]  }
  0x24   :  { %s1759_s13 = smov [#allocation8]   ;;  %s1760_s15 = smov [#allocation11]  }
  0x25   :  { %s41_s14 = sshll.u32 %s1759_s13, 4  ;;  %s65_s16 = sshll.u32 %s1760_s15, 4  ;;  %s42_s14 = int_to_ptr.vmem [resolvable:$true] %s41_s14  ;;  %s66_s16 = int_to_ptr.vmem [resolvable:$true] %s65_s16 }
  0x26   :  { %s1672_s17 = scalar_lea.vmem %s42_s14, 10240  ;;  %p1677_p2 = scmp.lt.s32.totalorder %s42_s14, %s42_s14 }
  0x27   :  { %p1673_p1 = scmp.ne.s32.totalorder %s42_s14, %s1672_s17  ;;  %p1678_p3 = scmp.lt.s32.totalorder %s1672_s17, %s1672_s17 }
  0x29   :  { %p1679_p4 = por %p1678_p3, %p1677_p2 }
  0x2b   :  { %p1680_p5 = pnand %p1679_p4, %p1673_p1 }
  0x2d   :  { %1683 = shalt.err (!%p1680_p5)
}
  0x2e   :  { %47 = dma.hbm_to_vmem [thread:$0]  %s2017_s2, 10240, %s42_s14, [#allocation7], %s1757_s7, %s1757_s7, %s1758_s8  }
  0x2f   :  { %s1692_s19 = scalar_lea.vmem %s66_s16, 5376  ;;  %p1697_p7 = scmp.lt.s32.totalorder %s66_s16, %s66_s16 }
  0x30   :  { %p1693_p6 = scmp.ne.s32.totalorder %s66_s16, %s1692_s19  ;;  %p1698_p8 = scmp.lt.s32.totalorder %s1692_s19, %s1692_s19 }
  0x32   :  { %p1699_p9 = por %p1698_p8, %p1697_p7 }
  0x34   :  { %p1700_p10 = pnand %p1699_p9, %p1693_p6 }
  0x36   :  { %1703 = shalt.err (!%p1700_p10)
}
  0x37   :  { %s1761_s0 = smov 256   ;;  %s1762_s20 = smov 16  }
  0x38   :  { %71 = dma.hbm_to_vmem [thread:$0]  %s2019_s4, 5376, %s66_s16, [#allocation10], %s1761_s0, %s1761_s0, %s1762_s20  }
  0x39   :  { %s1763_s23 = smov [#allocation12]  }
  0x3a   :  { %s77_s24 = sshll.u32 %s1763_s23, 4  ;;  %s78_s24 = int_to_ptr.vmem [resolvable:$true] %s77_s24 }
  0x3b   :  { %s1712_s25 = scalar_lea.vmem %s78_s24, 384  ;;  %p1717_p12 = scmp.lt.s32.totalorder %s78_s24, %s78_s24 }
  0x3c   :  { %p1713_p11 = scmp.ne.s32.totalorder %s78_s24, %s1712_s25  ;;  %p1718_p13 = scmp.lt.s32.totalorder %s1712_s25, %s1712_s25 }
  0x3e   :  { %p1719_p0 = por %p1718_p13, %p1717_p12 }
  0x40   :  { %p1720_p1 = pnand %p1719_p0, %p1713_p11 }
  0x42   :  { %1723 = shalt.err (!%p1720_p1)
}
  0x43   :  { %s1764_s2 = smov 128   ;;  %s1765_s26 = smov 8  }
  0x44   :  { %83 = dma.hbm_to_vmem [thread:$0]  %s2020_s5, 384, %s78_s24, [#allocation13], %s1764_s2, %s1764_s2, %s1765_s26  }
  0x45   :  { %1744 = dma.done.wait [#allocation4], 128  }
  0x46   :  { %1745 = vsyncadd [#allocation4], 4294967168 }
  0x47   :  { %1746 = dma.done.wait [#allocation7], 10368  }
  0x48   :  { %1747 = vsyncadd [#allocation7], 4294956928 }
  0x49   :  { %1748 = dma.done.wait [#allocation10], 15616  }
  0x4a   :  { %1749 = vsyncadd [#allocation10], 4294951680 }
  0x4b   :  { %1750 = dma.done.wait [#allocation13], 384  }
  0x4c   :  { %1751 = vsyncadd [#allocation13], 4294966912  ;;  %v1766_v0 = vmov 0.0   ;;  %v266_v1 = vld [vmem:[#allocation9 + $0x260] sm:$0xff]  ;;  %v268_v2 = vld [vmem:[#allocation9 + $0x270] sm:$0xff]  ;;  %vm1767_vm0 = vmmov 0  }
  0x4d   :  { %405 = vmatprep.mubr.f32.mxu1 %v1766_v0  ;;  %334 = vmatprep.mubr.f32.mxu0 %v1766_v0  ;;  %v265_v3 = vld [vmem:[#allocation9 + $0x258] sm:$0xff]  ;;  %v267_v4 = vld [vmem:[#allocation9 + $0x268] sm:$0xff]  ;;  %v260_v7 = vld [vmem:[#allocation9 + $0x230] sm:$0xff]  ;;  %vm700_vm1 = vcmask 785408   ;;  %s1768_s4 = smov 64   ;;  %s1769_s5 = smov 96  }
  0x4e   :  { %270 = vmatprep.subr.mxu0 %v266_v1  ;;  %341 = vmatprep.subr.mxu1 %v268_v2  ;;  %v261_v5 = vld [vmem:[#allocation9 + $0x238] sm:$0xff]  ;;  %v263_v6 = vld [vmem:[#allocation9 + $0x248] sm:$0xff]  ;;  %v262_v8 = vld [vmem:[#allocation9 + $0x240] sm:$0xff]  ;;  %s1770_s29 = smov 32   ;;  %vm796_vm2 = vcmask 261120   ;;  %s1771_s30 = smov [#allocation14]  }
  0x4f   :  { %271 = vmatpush1.msra.mxu0 %v265_v3  ;;  %342 = vmatpush1.msra.mxu1 %v267_v4  ;;  %v256_v9 = vld [vmem:[#allocation9 + $0x210] sm:$0xff]  ;;  %v258_v10 = vld [vmem:[#allocation9 + $0x220] sm:$0xff]  ;;  %v255_v11 = vld [vmem:[#allocation9 + $0x208] sm:$0xff]  ;;  %s1399_s7 = sshll.u32 %s1771_s30, 4  ;;  %s1400_s7 = int_to_ptr.vmem [resolvable:$true] %s1399_s7 }
  0x50   :  { %272 = vmatprep.subr.mxu0 %v261_v5  ;;  %343 = vmatprep.subr.mxu1 %v263_v6  ;;  %v257_v12 = vld [vmem:[#allocation9 + $0x218] sm:$0xff]  ;;  %v251_v13 = vld [vmem:[#allocation9 + $0x1e8] sm:$0xff]  ;;  %v250_v15 = vld [vmem:[#allocation9 + $0x1e0] sm:$0xff]  ;;  %s1724_s8 = scalar_lea.vmem %s1400_s7, 128  ;;  %p1729_p3 = scmp.lt.s32.totalorder %s1400_s7, %s1400_s7 }
  0x51   :  { %273 = vmatpush1.msra.mxu0 %v260_v7  ;;  %344 = vmatpush1.msra.mxu1 %v262_v8  ;;  %v253_v14 = vld [vmem:[#allocation9 + $0x1f8] sm:$0xff]  ;;  %v252_v16 = vld [vmem:[#allocation9 + $0x1f0] sm:$0xff]  ;;  %v246_v17 = vld [vmem:[#allocation9 + $0x1c0] sm:$0xff]  ;;  %p1725_p2 = scmp.ne.s32.totalorder %s1400_s7, %s1724_s8  ;;  %p1730_p4 = scmp.lt.s32.totalorder %s1724_s8, %s1724_s8 }
  0x52   :  { %274 = vmatprep.subr.mxu0 %v256_v9  ;;  %345 = vmatprep.subr.mxu1 %v258_v10  ;;  %v248_v18 = vld [vmem:[#allocation9 + $0x1d0] sm:$0xff]  ;;  %v245_v19 = vld [vmem:[#allocation9 + $0x1b8] sm:$0xff]  ;;  %v247_v20 = vld [vmem:[#allocation9 + $0x1c8] sm:$0xff] }
  0x53   :  { %275 = vmatpush1.msra.mxu0 %v255_v11  ;;  %346 = vmatpush1.msra.mxu1 %v257_v12  ;;  %v241_v21 = vld [vmem:[#allocation9 + $0x198] sm:$0xff]  ;;  %v243_v22 = vld [vmem:[#allocation9 + $0x1a8] sm:$0xff]  ;;  %v240_v23 = vld [vmem:[#allocation9 + $0x190] sm:$0xff]  ;;  %p1731_p5 = por %p1730_p4, %p1729_p3 }
  0x54   :  { %276 = vmatprep.subr.mxu0 %v251_v13  ;;  %347 = vmatprep.subr.mxu1 %v253_v14  ;;  %v242_v24 = vld [vmem:[#allocation9 + $0x1a0] sm:$0xff]  ;;  %v236_v25 = vld [vmem:[#allocation9 + $0x170] sm:$0xff]  ;;  %v235_v27 = vld [vmem:[#allocation9 + $0x168] sm:$0xff] }
  0x55   :  { %277 = vmatpush1.msra.mxu0 %v250_v15  ;;  %348 = vmatpush1.msra.mxu1 %v252_v16  ;;  %v238_v26 = vld [vmem:[#allocation9 + $0x180] sm:$0xff]  ;;  %v237_v28 = vld [vmem:[#allocation9 + $0x178] sm:$0xff]  ;;  %v231_v29 = vld [vmem:[#allocation9 + $0x148] sm:$0xff]  ;;  %p1732_p6 = pnand %p1731_p5, %p1725_p2 }
  0x56   :  { %278 = vmatprep.subr.mxu0 %v246_v17  ;;  %349 = vmatprep.subr.mxu1 %v248_v18  ;;  %v233_v30 = vld [vmem:[#allocation9 + $0x158] sm:$0xff]  ;;  %v230_v31 = vld [vmem:[#allocation9 + $0x140] sm:$0xff]  ;;  %v232_v32 = vld [vmem:[#allocation9 + $0x150] sm:$0xff] }
  0x57   :  { %279 = vmatpush1.msra.mxu0 %v245_v19  ;;  %350 = vmatpush1.msra.mxu1 %v247_v20  ;;  %v226_v33 = vld [vmem:[#allocation9 + $0x120] sm:$0xff]  ;;  %v228_v34 = vld [vmem:[#allocation9 + $0x130] sm:$0xff]  ;;  %v225_v35 = vld [vmem:[#allocation9 + $0x118] sm:$0xff] }
  0x58   :  { %280 = vmatprep.subr.mxu0 %v241_v21  ;;  %351 = vmatprep.subr.mxu1 %v243_v22  ;;  %v227_v36 = vld [vmem:[#allocation9 + $0x128] sm:$0xff]  ;;  %v221_v37 = vld [vmem:[#allocation9 + $0xf8] sm:$0xff]  ;;  %v220_v39 = vld [vmem:[#allocation9 + $0xf0] sm:$0xff] }
  0x59   :  { %281 = vmatpush1.msra.mxu0 %v240_v23  ;;  %352 = vmatpush1.msra.mxu1 %v242_v24  ;;  %v223_v38 = vld [vmem:[#allocation9 + $0x108] sm:$0xff]  ;;  %v222_v40 = vld [vmem:[#allocation9 + $0x100] sm:$0xff]  ;;  %v216_v41 = vld [vmem:[#allocation9 + $0xd0] sm:$0xff] }
  0x5a   :  { %282 = vmatprep.subr.mxu0 %v236_v25  ;;  %353 = vmatprep.subr.mxu1 %v238_v26  ;;  %v218_v42 = vld [vmem:[#allocation9 + $0xe0] sm:$0xff]  ;;  %v215_v43 = vld [vmem:[#allocation9 + $0xc8] sm:$0xff]  ;;  %v217_v44 = vld [vmem:[#allocation9 + $0xd8] sm:$0xff] }
  0x5b   :  { %283 = vmatpush1.msra.mxu0 %v235_v27  ;;  %354 = vmatpush1.msra.mxu1 %v237_v28  ;;  %v211_v45 = vld [vmem:[#allocation9 + $0xa8] sm:$0xff]  ;;  %v213_v46 = vld [vmem:[#allocation9 + $0xb8] sm:$0xff]  ;;  %v210_v47 = vld [vmem:[#allocation9 + $0xa0] sm:$0xff] }
  0x5c   :  { %284 = vmatprep.subr.mxu0 %v231_v29  ;;  %355 = vmatprep.subr.mxu1 %v233_v30  ;;  %v212_v48 = vld [vmem:[#allocation9 + $0xb0] sm:$0xff]  ;;  %v206_v49 = vld [vmem:[#allocation9 + $0x80] sm:$0xff]  ;;  %v205_v51 = vld [vmem:[#allocation9 + $0x78] sm:$0xff] }
  0x5d   :  { %285 = vmatpush1.msra.mxu0 %v230_v31  ;;  %356 = vmatpush1.msra.mxu1 %v232_v32  ;;  %v208_v50 = vld [vmem:[#allocation9 + $0x90] sm:$0xff]  ;;  %v207_v52 = vld [vmem:[#allocation9 + $0x88] sm:$0xff]  ;;  %v201_v53 = vld [vmem:[#allocation9 + $0x58] sm:$0xff] }
  0x5e   :  { %286 = vmatprep.subr.mxu0 %v226_v33  ;;  %357 = vmatprep.subr.mxu1 %v228_v34  ;;  %v203_v54 = vld [vmem:[#allocation9 + $0x68] sm:$0xff]  ;;  %v200_v55 = vld [vmem:[#allocation9 + $0x50] sm:$0xff]  ;;  %v202_v56 = vld [vmem:[#allocation9 + $0x60] sm:$0xff] }
  0x5f   :  { %287 = vmatpush1.msra.mxu0 %v225_v35  ;;  %358 = vmatpush1.msra.mxu1 %v227_v36  ;;  %v196_v57 = vld [vmem:[#allocation9 + $0x30] sm:$0xff]  ;;  %v198_v58 = vld [vmem:[#allocation9 + $0x40] sm:$0xff]  ;;  %v195_v59 = vld [vmem:[#allocation9 + $0x28] sm:$0xff] }
  0x60   :  { %288 = vmatprep.subr.mxu0 %v221_v37  ;;  %359 = vmatprep.subr.mxu1 %v223_v38  ;;  %v197_v60 = vld [vmem:[#allocation9 + $0x38] sm:$0xff]  ;;  %v191_v61 = vld [vmem:[#allocation9 + $0x8] sm:$0xff]  ;;  %v190_v63 = vld [vmem:[#allocation9] sm:$0xff] }
  0x61   :  { %289 = vmatpush1.msra.mxu0 %v220_v39  ;;  %360 = vmatpush1.msra.mxu1 %v222_v40  ;;  %v193_v62 = vld [vmem:[#allocation9 + $0x18] sm:$0xff]  ;;  %v192_v1 = vld [vmem:[#allocation9 + $0x10] sm:$0xff]  ;;  %v186_v3 = vld [vmem:[#allocation8 + $0x260] sm:$0xff] }
  0x62   :  { %290 = vmatprep.subr.mxu0 %v216_v41  ;;  %361 = vmatprep.subr.mxu1 %v218_v42  ;;  %v1827_v2 = vld [vmem:[#allocation6] sm:$0xff]  ;;  %v264_v7 = vld [vmem:[#allocation9 + $0x250] sm:$0xff]  ;;  %v259_v10 = vld [vmem:[#allocation9 + $0x228] sm:$0xff] }
  0x63   :  { %291 = vmatpush1.msra.mxu0 %v215_v43  ;;  %362 = vmatpush1.msra.mxu1 %v217_v44  ;;  %v269_v4 = vld [vmem:[#allocation9 + $0x278] sm:$0xff]  ;;  %v180_v8 = vld [vmem:[#allocation8 + $0x230] sm:$0xff]  ;;  %v175_v11 = vld [vmem:[#allocation8 + $0x208] sm:$0xff] }
  0x64   :  { %292 = vmatprep.subr.mxu0 %v211_v45  ;;  %363 = vmatprep.subr.mxu1 %v213_v46  ;;  %v185_v5 = vld [vmem:[#allocation8 + $0x258] sm:$0xff]  ;;  %v176_v9 = vld [vmem:[#allocation8 + $0x210] sm:$0xff]  ;;  %v171_v12 = vld [vmem:[#allocation8 + $0x1e8] sm:$0xff] }
  0x65   :  { %293 = vmatpush1.msra.mxu0 %v210_v47  ;;  %364 = vmatpush1.msra.mxu1 %v212_v48  ;;  %v181_v6 = vld [vmem:[#allocation8 + $0x238] sm:$0xff]  ;;  %v254_v13 = vld [vmem:[#allocation9 + $0x200] sm:$0xff]  ;;  %v244_v19 = vld [vmem:[#allocation9 + $0x1b0] sm:$0xff] }
  0x66   :  { %294 = vmatprep.subr.mxu0 %v206_v49  ;;  %365 = vmatprep.subr.mxu1 %v208_v50  ;;  %v170_v14 = vld [vmem:[#allocation8 + $0x1e0] sm:$0xff]  ;;  %v249_v16 = vld [vmem:[#allocation9 + $0x1d8] sm:$0xff]  ;;  %v160_v20 = vld [vmem:[#allocation8 + $0x190] sm:$0xff] }
  0x67   :  { %295 = vmatpush1.msra.mxu0 %v205_v51  ;;  %366 = vmatpush1.msra.mxu1 %v207_v52  ;;  %v166_v15 = vld [vmem:[#allocation8 + $0x1c0] sm:$0xff]  ;;  %v165_v17 = vld [vmem:[#allocation8 + $0x1b8] sm:$0xff]  ;;  %v156_v21 = vld [vmem:[#allocation8 + $0x170] sm:$0xff] }
  0x68   :  { %296 = vmatprep.subr.mxu0 %v201_v53  ;;  %367 = vmatprep.subr.mxu1 %v203_v54  ;;  %v161_v18 = vld [vmem:[#allocation8 + $0x198] sm:$0xff]  ;;  %v239_v22 = vld [vmem:[#allocation9 + $0x188] sm:$0xff]  ;;  %v234_v25 = vld [vmem:[#allocation9 + $0x160] sm:$0xff] }
  0x69   :  { %297 = vmatpush1.msra.mxu0 %v200_v55  ;;  %368 = vmatpush1.msra.mxu1 %v202_v56  ;;  %v155_v23 = vld [vmem:[#allocation8 + $0x168] sm:$0xff]  ;;  %v150_v26 = vld [vmem:[#allocation8 + $0x140] sm:$0xff]  ;;  %v229_v28 = vld [vmem:[#allocation9 + $0x138] sm:$0xff] }
  0x6a   :  { %298 = vmatprep.subr.mxu0 %v196_v57  ;;  %369 = vmatprep.subr.mxu1 %v198_v58  ;;  %v151_v24 = vld [vmem:[#allocation8 + $0x148] sm:$0xff]  ;;  %v146_v27 = vld [vmem:[#allocation8 + $0x120] sm:$0xff]  ;;  %v145_v29 = vld [vmem:[#allocation8 + $0x118] sm:$0xff] }
  0x6b   :  { %299 = vmatpush1.msra.mxu0 %v195_v59  ;;  %370 = vmatpush1.msra.mxu1 %v197_v60  ;;  %v141_v30 = vld [vmem:[#allocation8 + $0xf8] sm:$0xff]  ;;  %v224_v31 = vld [vmem:[#allocation9 + $0x110] sm:$0xff]  ;;  %v219_v34 = vld [vmem:[#allocation9 + $0xe8] sm:$0xff] }
  0x6c   :  { %300 = vmatprep.subr.mxu0 %v191_v61  ;;  %371 = vmatprep.subr.mxu1 %v193_v62  ;;  %v140_v32 = vld [vmem:[#allocation8 + $0xf0] sm:$0xff]  ;;  %v135_v35 = vld [vmem:[#allocation8 + $0xc8] sm:$0xff]  ;;  %v214_v37 = vld [vmem:[#allocation9 + $0xc0] sm:$0xff] }
  0x6d   :  { %301 = vmatpush1.msra.mxu0 %v190_v63  ;;  %372 = vmatpush1.msra.mxu1 %v192_v1  ;;  %v136_v33 = vld [vmem:[#allocation8 + $0xd0] sm:$0xff]  ;;  %v131_v36 = vld [vmem:[#allocation8 + $0xa8] sm:$0xff]  ;;  %v130_v38 = vld [vmem:[#allocation8 + $0xa0] sm:$0xff] }
  0x6e   :  { %406 = vmatmul.mubr.f32.vlgmr.msra.gmra.mxu1 %v1827_v2  ;;  %1463 = vmatprep.subr.mxu0 %v1766_v0  ;;  %v126_v39 = vld [vmem:[#allocation8 + $0x80] sm:$0xff]  ;;  %v209_v40 = vld [vmem:[#allocation9 + $0x98] sm:$0xff]  ;;  %v204_v43 = vld [vmem:[#allocation9 + $0x70] sm:$0xff] }
  0x6f   :  { %482 = vmatprep.subr.mxu1 %v186_v3  ;;  %335 = vmatmul.mubr.f32.vlgmr.msra.gmra.mxu0 %v1827_v2  ;;  %v125_v41 = vld [vmem:[#allocation8 + $0x78] sm:$0xff]  ;;  %v120_v44 = vld [vmem:[#allocation8 + $0x50] sm:$0xff]  ;;  %v199_v46 = vld [vmem:[#allocation9 + $0x48] sm:$0xff] }
  0x70   :  { %1464 = vmatpush3.msra.mxu0 %v269_v4  ;;  %483 = vmatpush1.msra.mxu1 %v185_v5  ;;  %v121_v42 = vld [vmem:[#allocation8 + $0x58] sm:$0xff]  ;;  %v116_v45 = vld [vmem:[#allocation8 + $0x30] sm:$0xff]  ;;  %v115_v47 = vld [vmem:[#allocation8 + $0x28] sm:$0xff] }
  0x71   :  { %1465 = vmatprep.subr.mxu0 %v1766_v0  ;;  %484 = vmatprep.subr.mxu1 %v181_v6  ;;  %v111_v48 = vld [vmem:[#allocation8 + $0x8] sm:$0xff]  ;;  %v194_v49 = vld [vmem:[#allocation9 + $0x20] sm:$0xff]  ;;  %v1847_v51 = vld [vmem:[#allocation3] sm:$0xff] }
  0x72   :  { %1466 = vmatpush3.msra.mxu0 %v264_v7  ;;  %485 = vmatpush1.msra.mxu1 %v180_v8  ;;  %v110_v50 = vld [vmem:[#allocation8] sm:$0xff]  ;;  %v188_v52 = vld [vmem:[#allocation8 + $0x270] sm:$0xff]  ;;  %v187_v53 = vld [vmem:[#allocation8 + $0x268] sm:$0xff] }
  0x73   :  { %1467 = vmatprep.subr.mxu0 %v1766_v0  ;;  %486 = vmatprep.subr.mxu1 %v176_v9  ;;  %v183_v54 = vld [vmem:[#allocation8 + $0x248] sm:$0xff]  ;;  %v182_v55 = vld [vmem:[#allocation8 + $0x240] sm:$0xff]  ;;  %v177_v57 = vld [vmem:[#allocation8 + $0x218] sm:$0xff] }
  0x74   :  { %1468 = vmatpush3.msra.mxu0 %v259_v10  ;;  %487 = vmatpush1.msra.mxu1 %v175_v11  ;;  %v178_v56 = vld [vmem:[#allocation8 + $0x220] sm:$0xff]  ;;  %v173_v58 = vld [vmem:[#allocation8 + $0x1f8] sm:$0xff]  ;;  %v172_v59 = vld [vmem:[#allocation8 + $0x1f0] sm:$0xff] }
  0x75   :  { %1469 = vmatprep.subr.mxu0 %v1766_v0  ;;  %488 = vmatprep.subr.mxu1 %v171_v12  ;;  %v168_v60 = vld [vmem:[#allocation8 + $0x1d0] sm:$0xff]  ;;  %v167_v61 = vld [vmem:[#allocation8 + $0x1c8] sm:$0xff]  ;;  %v162_v63 = vld [vmem:[#allocation8 + $0x1a0] sm:$0xff] }
  0x76   :  { %1470 = vmatpush3.msra.mxu0 %v254_v13  ;;  %489 = vmatpush1.msra.mxu1 %v170_v14  ;;  %v163_v62 = vld [vmem:[#allocation8 + $0x1a8] sm:$0xff]  ;;  %v158_v1 = vld [vmem:[#allocation8 + $0x180] sm:$0xff]  ;;  %v157_v3 = vld [vmem:[#allocation8 + $0x178] sm:$0xff] }
  0x77   :  { %1471 = vmatprep.subr.mxu0 %v1766_v0  ;;  %490 = vmatprep.subr.mxu1 %v166_v15  ;;  %v153_v4 = vld [vmem:[#allocation8 + $0x158] sm:$0xff]  ;;  %v152_v5 = vld [vmem:[#allocation8 + $0x150] sm:$0xff]  ;;  %v147_v7 = vld [vmem:[#allocation8 + $0x128] sm:$0xff] }
  0x78   :  { %1472 = vmatpush3.msra.mxu0 %v249_v16  ;;  %491 = vmatpush1.msra.mxu1 %v165_v17  ;;  %v148_v6 = vld [vmem:[#allocation8 + $0x130] sm:$0xff]  ;;  %v143_v8 = vld [vmem:[#allocation8 + $0x108] sm:$0xff]  ;;  %v142_v9 = vld [vmem:[#allocation8 + $0x100] sm:$0xff] }
  0x79   :  { %1473 = vmatprep.subr.mxu0 %v1766_v0  ;;  %492 = vmatprep.subr.mxu1 %v161_v18  ;;  %v138_v10 = vld [vmem:[#allocation8 + $0xe0] sm:$0xff]  ;;  %v137_v11 = vld [vmem:[#allocation8 + $0xd8] sm:$0xff]  ;;  %v132_v13 = vld [vmem:[#allocation8 + $0xb0] sm:$0xff] }
  0x7a   :  { %1474 = vmatpush3.msra.mxu0 %v244_v19  ;;  %493 = vmatpush1.msra.mxu1 %v160_v20  ;;  %v133_v12 = vld [vmem:[#allocation8 + $0xb8] sm:$0xff]  ;;  %v128_v14 = vld [vmem:[#allocation8 + $0x90] sm:$0xff]  ;;  %v127_v15 = vld [vmem:[#allocation8 + $0x88] sm:$0xff] }
  0x7b   :  { %1475 = vmatprep.subr.mxu0 %v1766_v0  ;;  %494 = vmatprep.subr.mxu1 %v156_v21  ;;  %v123_v16 = vld [vmem:[#allocation8 + $0x68] sm:$0xff]  ;;  %v122_v17 = vld [vmem:[#allocation8 + $0x60] sm:$0xff]  ;;  %v117_v19 = vld [vmem:[#allocation8 + $0x38] sm:$0xff] }
  0x7c   :  { %1476 = vmatpush3.msra.mxu0 %v239_v22  ;;  %495 = vmatpush1.msra.mxu1 %v155_v23  ;;  %v118_v18 = vld [vmem:[#allocation8 + $0x40] sm:$0xff]  ;;  %v113_v20 = vld [vmem:[#allocation8 + $0x18] sm:$0xff]  ;;  %v112_v21 = vld [vmem:[#allocation8 + $0x10] sm:$0xff]  ;;  %v695_v22 = vlaneseq }
  0x7d   :  { %1477 = vmatprep.subr.mxu0 %v1766_v0  ;;  %496 = vmatprep.subr.mxu1 %v151_v24 }
  0x7e   :  { %1478 = vmatpush3.msra.mxu0 %v234_v25  ;;  %497 = vmatpush1.msra.mxu1 %v150_v26  ;;  %v1862_v23 = vshrl.u32 %v695_v22, 7 }
  0x7f   :  { %1479 = vmatprep.subr.mxu0 %v1766_v0  ;;  %498 = vmatprep.subr.mxu1 %v146_v27  ;;  %v1869_v27 = vld [vmem:[#allocation12] sm:$0xff] }
  0x80   :  { %1480 = vmatpush3.msra.mxu0 %v229_v28  ;;  %499 = vmatpush1.msra.mxu1 %v145_v29  ;;  %v1867_v26 = vsub.s32 0, %v1862_v23  ;;  %v1872_v28 = vsub.s32 1, %v1862_v23 }
  0x81   :  { %1481 = vmatprep.subr.mxu0 %v1766_v0  ;;  %500 = vmatprep.subr.mxu1 %v141_v30 }
  0x82   :  { %1482 = vmatpush3.msra.mxu0 %v224_v31  ;;  %501 = vmatpush1.msra.mxu1 %v140_v32  ;;  %v698_v31 = vrot.slane %v1869_v27, %v1867_v26 }
  0x83   :  { %1483 = vmatprep.subr.mxu0 %v1766_v0  ;;  %502 = vmatprep.subr.mxu1 %v136_v33 }
  0x84   :  { %1484 = vmatpush3.msra.mxu0 %v219_v34  ;;  %503 = vmatpush1.msra.mxu1 %v135_v35  ;;  %v731_v34 = vrot.slane %v1869_v27, %v1872_v28 }
  0x85   :  { %1485 = vmatprep.subr.mxu0 %v1766_v0  ;;  %504 = vmatprep.subr.mxu1 %v131_v36 }
  0x86   :  { %1486 = vmatpush3.msra.mxu0 %v214_v37  ;;  %505 = vmatpush1.msra.mxu1 %v130_v38 }
  0x87   :  { %1487 = vmatprep.subr.mxu0 %v1766_v0  ;;  %506 = vmatprep.subr.mxu1 %v126_v39 }
  0x88   :  { %1488 = vmatpush3.msra.mxu0 %v209_v40  ;;  %507 = vmatpush1.msra.mxu1 %v125_v41 }
  0x89   :  { %1489 = vmatprep.subr.mxu0 %v1766_v0  ;;  %508 = vmatprep.subr.mxu1 %v121_v42 }
  0x8a   :  { %1490 = vmatpush3.msra.mxu0 %v204_v43  ;;  %509 = vmatpush1.msra.mxu1 %v120_v44 }
  0x8b   :  { %1491 = vmatprep.subr.mxu0 %v1766_v0  ;;  %510 = vmatprep.subr.mxu1 %v116_v45 }
  0x8c   :  { %1492 = vmatpush3.msra.mxu0 %v199_v46  ;;  %511 = vmatpush1.msra.mxu1 %v115_v47 }
  0x8d   :  { %1493 = vmatprep.subr.mxu0 %v1766_v0  ;;  %512 = vmatprep.subr.mxu1 %v111_v48 }
  0x8e   :  { %1494 = vmatpush3.msra.mxu0 %v194_v49  ;;  %513 = vmatpush1.msra.mxu1 %v110_v50 }
  0x8f   :  { %546 = vmatprep.mubr.f32.mxu1 %v1766_v0  ;;  %1495 = vmatprep.mubr.msk.f32.mxu0 %vm1767_vm0, %v1766_v0 }
  0x90   :  { %547 = vmatmul.mubr.f32.vlgmr.msra.gmra.mxu1 %v1847_v51  ;;  %553 = vmatprep.subr.mxu0 %v188_v52 }
  0x91   :  { %1496 = vmatmul.mubr.f32.vlgmr.msra.gmra.mxu0 %v1827_v2  ;;  %1498 = vmatprep.subr.mxu1 %v1766_v0 }
  0x92   :  { %554 = vmatpush1.msra.mxu0 %v187_v53  ;;  %617 = vmatprep.mubr.f32.mxu0 %v1766_v0 }
  0x93   :  { %555 = vmatprep.subr.mxu0 %v183_v54  ;;  %1530 = vmatprep.mubr.msk.f32.mxu1 %vm1767_vm0, %v1766_v0 }
  0x94   :  { %556 = vmatpush1.msra.mxu0 %v182_v55 }
  0x95   :  { %557 = vmatprep.subr.mxu0 %v178_v56  ;;  %v1887_v56 = vsub.s32 4, %v1862_v23 }
  0x96   :  { %558 = vmatpush1.msra.mxu0 %v177_v57  ;;  %v1890_v57 = vsub.s32 5, %v1862_v23 }
  0x97   :  { %559 = vmatprep.subr.mxu0 %v173_v58 }
  0x98   :  { %560 = vmatpush1.msra.mxu0 %v172_v59  ;;  %v752_v59 = vrot.slane %v1869_v27, %v1887_v56 }
  0x99   :  { %561 = vmatprep.subr.mxu0 %v168_v60 }
  0x9a   :  { %562 = vmatpush1.msra.mxu0 %v167_v61 }
  0x9b   :  { %563 = vmatprep.subr.mxu0 %v163_v62  ;;  %v757_v62 = vrot.slane %v1869_v27, %v1890_v57 }
  0x9c   :  { %564 = vmatpush1.msra.mxu0 %v162_v63 }
  0x9d   :  { %565 = vmatprep.subr.mxu0 %v158_v1 }
  0x9e   :  { %566 = vmatpush1.msra.mxu0 %v157_v3 }
  0x9f   :  { %567 = vmatprep.subr.mxu0 %v153_v4 }
  0xa0   :  { %568 = vmatpush1.msra.mxu0 %v152_v5 }
  0xa1   :  { %569 = vmatprep.subr.mxu0 %v148_v6 }
  0xa2   :  { %570 = vmatpush1.msra.mxu0 %v147_v7 }
  0xa3   :  { %571 = vmatprep.subr.mxu0 %v143_v8 }
  0xa4   :  { %572 = vmatpush1.msra.mxu0 %v142_v9 }
  0xa5   :  { %573 = vmatprep.subr.mxu0 %v138_v10 }
  0xa6   :  { %574 = vmatpush1.msra.mxu0 %v137_v11  ;;  %v1898_v11 = vsub.s32 2, %v1862_v23 }
  0xa7   :  { %575 = vmatprep.subr.mxu0 %v133_v12 }
  0xa8   :  { %576 = vmatpush1.msra.mxu0 %v132_v13 }
  0xa9   :  { %577 = vmatprep.subr.mxu0 %v128_v14 }
  0xaa   :  { %578 = vmatpush1.msra.mxu0 %v127_v15  ;;  %v721_v15 = vrot.slane %v1869_v27, %v1898_v11 }
  0xab   :  { %579 = vmatprep.subr.mxu0 %v123_v16  ;;  %v1903_v16 = vsub.s32 3, %v1862_v23  ;;  %v189_v23 = vld [vmem:[#allocation8 + $0x278] sm:$0xff] }
  0xac   :  { %580 = vmatpush1.msra.mxu0 %v122_v17  ;;  %1499 = vmatpush3.msra.mxu1 %v189_v23 }
  0xad   :  { %581 = vmatprep.subr.mxu0 %v118_v18  ;;  %v726_v18 = vrot.slane %v1869_v27, %v1903_v16  ;;  %1500 = vmatprep.subr.mxu1 %v1766_v0  ;;  %v179_v27 = vld [vmem:[#allocation8 + $0x228] sm:$0xff] }
  0xae   :  { %582 = vmatpush1.msra.mxu0 %v117_v19 }
  0xaf   :  { %583 = vmatprep.subr.mxu0 %v113_v20 }
  0xb0   :  { %584 = vmatpush1.msra.mxu0 %v112_v21 }
  0xb1   :  { %618 = vmatmul.mubr.f32.vlgmr.msra.gmra.mxu0 %v1847_v51  ;;  %1533 = vmatprep.subr.mxu0 %v1766_v0 }
  0xb2   :  { %1541 = vmatprep.mubr.msk.f32.mxu0 %vm1767_vm0, %v1766_v0 }
 0x12e   :  { %v1864_v24 = vpop.f32.mrf.mxu1 }
 0x12f   :  { %v336_v25 = vpop.f32.mrf.mxu0 }
 0x130   :  { %v1874_v29 = vpop.f32.mrf.mxu1 }
 0x131   :  { %v338_v30 = vpop.f32.mrf.mxu0 }
 0x150   :  { %v548_v32 = vpop.f32.mrf.mxu1 }
 0x151   :  { %v549_v33 = vadd.f32 %v548_v32, %v336_v25  ;;  %v1880_v35 = vpop.f32.mrf.mxu0 }
 0x152   :  { %v550_v36 = vpop.f32.mrf.mxu1 }
 0x153   :  { %v699_v37 = vadd.f32 %v698_v31, %v549_v33  ;;  %v551_v38 = vadd.f32 %v550_v36, %v338_v30  ;;  %v1497_v39 = vpop.f32.mrf.mxu0  ;;  %v184_v33 = vld [vmem:[#allocation8 + $0x250] sm:$0xff]  ;;  %v169_v36 = vld [vmem:[#allocation8 + $0x1d8] sm:$0xff] }
 0x154   :  { %1501 = vmatpush3.msra.mxu1 %v184_v33  ;;  %v154_v39 = vld [vmem:[#allocation8 + $0x160] sm:$0xff] }
 0x155   :  { %v732_v40 = vadd.f32 %v731_v34, %v551_v38  ;;  %v701_v41 = vsel %vm700_vm1, %v699_v37, 0.0  ;;  %v706_v42 = vmul.f32 %v699_v37, %v699_v37  ;;  %1502 = vmatprep.subr.mxu1 %v1766_v0  ;;  %v174_v34 = vld [vmem:[#allocation8 + $0x200] sm:$0xff]  ;;  %v159_v38 = vld [vmem:[#allocation8 + $0x188] sm:$0xff] }
 0x156   :  { %702 = vadd.xlane.f32.xlu1 %v701_v41  ;;  %1503 = vmatpush3.msra.mxu1 %v179_v27  ;;  %v144_v41 = vld [vmem:[#allocation8 + $0x110] sm:$0xff] }
 0x157   :  { %v733_v43 = vsel %vm700_vm1, %v732_v40, 0.0  ;;  %v737_v44 = vmul.f32 %v732_v40, %v732_v40  ;;  %v707_v45 = vsel %vm700_vm1, %v706_v42, 0.0  ;;  %1504 = vmatprep.subr.mxu1 %v1766_v0 }
 0x158   :  { %734 = vadd.xlane.f32.xlu0 %v733_v43  ;;  %1505 = vmatpush3.msra.mxu1 %v174_v34 }
 0x159   :  { %v738_v46 = vsel %vm700_vm1, %v737_v44, 0.0  ;;  %1506 = vmatprep.subr.mxu1 %v1766_v0  ;;  %v139_v44 = vld [vmem:[#allocation8 + $0xe8] sm:$0xff] }
 0x15a   :  { %708 = vadd.xlane.f32.xlu1 %v707_v45  ;;  %1507 = vmatpush3.msra.mxu1 %v169_v36  ;;  %v134_v45 = vld [vmem:[#allocation8 + $0xc0] sm:$0xff] }
 0x15b   :  { %1508 = vmatprep.subr.mxu1 %v1766_v0 }
 0x15c   :  { %739 = vadd.xlane.f32.xlu0 %v738_v46  ;;  %v129_v46 = vld [vmem:[#allocation8 + $0x98] sm:$0xff] }
 0x1df   :  { %v703_v3 = vpop.xlane.xlu1 %702 }
 0x1e0   :  { %v705_v5 = vmul.f32 0.010416667, %v703_v3 }
 0x1e1   :  { %v735_v47 = vpop.xlane.xlu0 %734 }
 0x1e2   :  { %v736_v48 = vmul.f32 0.010416667, %v735_v47  ;;  %v711_v7 = vmul.f32 %v705_v5, %v705_v5  ;;  %v714_v13 = vsub.f32 %v699_v37, %v705_v5  ;;  %v164_v37 = vld [vmem:[#allocation8 + $0x1b0] sm:$0xff] }
 0x1e3   :  { %v709_v4 = vpop.xlane.xlu1 %708  ;;  %1509 = vmatpush3.msra.mxu1 %v164_v37  ;;  %v124_v47 = vld [vmem:[#allocation8 + $0x70] sm:$0xff] }
 0x1e4   :  { %v742_v50 = vmul.f32 %v736_v48, %v736_v48  ;;  %v745_v58 = vsub.f32 %v732_v40, %v736_v48  ;;  %v710_v6 = vmul.f32 0.010416667, %v709_v4  ;;  %1510 = vmatprep.subr.mxu1 %v1766_v0  ;;  %v149_v40 = vld [vmem:[#allocation8 + $0x138] sm:$0xff]  ;;  %v119_v48 = vld [vmem:[#allocation8 + $0x48] sm:$0xff] }
 0x1e5   :  { %v740_v49 = vpop.xlane.xlu0 %739  ;;  %1511 = vmatpush3.msra.mxu1 %v159_v38 }
 0x1e6   :  { %v741_v52 = vmul.f32 0.010416667, %v740_v49  ;;  %v712_v8 = vsub.f32 %v710_v6, %v711_v7  ;;  %1512 = vmatprep.subr.mxu1 %v1766_v0  ;;  %v114_v49 = vld [vmem:[#allocation8 + $0x20] sm:$0xff] }
 0x1e7   :  { %1513 = vmatpush3.msra.mxu1 %v154_v39 }
 0x1e8   :  { %v743_v53 = vsub.f32 %v741_v52, %v742_v50  ;;  %v713_v9 = vmax.f32 %v712_v8, 0.0  ;;  %1514 = vmatprep.subr.mxu1 %v1766_v0  ;;  %v619_v52 = vpop.f32.mrf.mxu0 }
 0x1e9   :  { %1515 = vmatpush3.msra.mxu1 %v149_v40  ;;  %v620_v27 = vadd.f32 %v619_v52, %v1864_v24 }
 0x1ea   :  { %v744_v54 = vmax.f32 %v743_v53, 0.0  ;;  %v715_v10 = vadd.f32 1e-05, %v713_v9  ;;  %1516 = vmatprep.subr.mxu1 %v1766_v0  ;;  %v621_v53 = vpop.f32.mrf.mxu0 }
 0x1eb   :  { %1517 = vmatpush3.msra.mxu1 %v144_v41 }
 0x1ec   :  { %v746_v55 = vadd.f32 1e-05, %v744_v54  ;;  %1518 = vmatprep.subr.mxu1 %v1766_v0  ;;  %v1932_v54 = vld [vmem:[#allocation12 + $0x8] sm:$0xff] }
 0x1ed   :  { %1519 = vmatpush3.msra.mxu1 %v139_v44  ;;  %v875_v34 = vrot.slane %v1932_v54, %v1867_v26 }
 0x1ee   :  { %1573 = vrsqrt.f32 %v746_v55  ;;  %1520 = vmatprep.subr.mxu1 %v1766_v0  ;;  %v622_v55 = vadd.f32 %v621_v53, %v1874_v29 }
 0x1ef   :  { %1575 = vrsqrt.f32 %v715_v10  ;;  %1521 = vmatpush3.msra.mxu1 %v134_v45 }
 0x1f0   :  { %1522 = vmatprep.subr.mxu1 %v1766_v0 }
 0x1f1   :  { %1523 = vmatpush3.msra.mxu1 %v129_v46 }
 0x1f2   :  { %1524 = vmatprep.subr.mxu1 %v1766_v0 }
 0x1f3   :  { %1525 = vmatpush3.msra.mxu1 %v124_v47 }
 0x1f4   :  { %1526 = vmatprep.subr.mxu1 %v1766_v0 }
 0x1f5   :  { %1527 = vmatpush3.msra.mxu1 %v119_v48 }
 0x1f6   :  { %1528 = vmatprep.subr.mxu1 %v1766_v0 }
 0x1f7   :  { %1529 = vmatpush3.msra.mxu1 %v114_v49 }
 0x1f8   :  { %1531 = vmatmul.mubr.f32.vlgmr.msra.gmra.mxu1 %v1847_v51  ;;  %1544 = vmatprep.subr.mxu1 %v1766_v0  ;;  %v906_v51 = vrot.slane %v1932_v54, %v1872_v28 }
 0x1f9   :  { %1552 = vmatprep.mubr.msk.f32.mxu1 %vm1767_vm0, %v1766_v0 }
 0x1fb   :  { %v1574_v60 = vpop.eup %1573 }
 0x1fc   :  { %v748_v61 = vmul.f32 %v1574_v60, %v745_v58  ;;  %v1576_v12 = vpop.eup %1575  ;;  %v907_v58 = vadd.f32 %v906_v51, %v622_v55  ;;  %v792_v60 = vld [vmem:[#allocation11 + $0x30] sm:$0xff]  ;;  %v901_v55 = vrot.slane %v1932_v54, %v1903_v16 }
 0x1fd   :  { %v717_v14 = vmul.f32 %v1576_v12, %v714_v13  ;;  %1534 = vmatpush3.msra.mxu0 %v792_v60 }
 0x1fe   :  { %v753_v63 = vmul.f32 %v752_v59, %v748_v61  ;;  %v908_v59 = vsel %vm700_vm1, %v907_v58, 0.0  ;;  %v791_v61 = vld [vmem:[#allocation11 + $0x20] sm:$0xff]  ;;  %1535 = vmatprep.subr.mxu0 %v1766_v0  ;;  %v912_v7 = vmul.f32 %v907_v58, %v907_v58 }
 0x1ff   :  { %v722_v17 = vmul.f32 %v721_v15, %v717_v14  ;;  %1536 = vmatpush3.msra.mxu0 %v791_v61 }
 0x200   :  { %v758_v1 = vadd.f32 %v757_v62, %v753_v63  ;;  %v790_v62 = vld [vmem:[#allocation11 + $0x10] sm:$0xff]  ;;  %1537 = vmatprep.subr.mxu0 %v1766_v0  ;;  %v789_v63 = vld [vmem:[#allocation11] sm:$0xff]  ;;  %v913_v8 = vsel %vm700_vm1, %v912_v7, 0.0 }
 0x201   :  { %v727_v19 = vadd.f32 %v726_v18, %v722_v17  ;;  %1538 = vmatpush3.msra.mxu0 %v790_v62 }
 0x202   :  { %767 = vrot.lane.b32.xlu0 %v758_v1, %s1768_s4  ;;  %1539 = vmatprep.subr.mxu0 %v1766_v0 }
 0x203   :  { %v759_v20 = vadd.f32 %v758_v1, %v727_v19  ;;  %1540 = vmatpush3.msra.mxu0 %v789_v63 }
 0x205   :  { %v1411_v21 = vmul.f32 -1.442695, %v759_v20 }
 0x207   :  { %1577 = vpow2.f32 %v1411_v21 }
 0x214   :  { %v1578_v22 = vpop.eup %1577 }
 0x215   :  { %v763_v25 = vadd.f32 1.0, %v1578_v22 }
 0x217   :  { %1579 = vrcp.f32 %v763_v25  ;;  %v927_v25 = vrot.slane %v1932_v54, %v1887_v56 }
 0x224   :  { %v1907_v30 = vpop.eup %1579 }
 0x225   :  { %v777_v1 = vsub.f32 1.0, %v1907_v30 }
 0x274   :  { %v768_v31 = vpop.permute.xlu0 %767 }
 0x275   :  { %v770_v32 = vmul.f32 %v1907_v30, %v768_v31 }
 0x277   :  { %772 = vrot.lane.b32.xlu1 %v770_v32, %s1768_s4  ;;  %v932_v32 = vrot.slane %v1932_v54, %v1890_v57 }
 0x2b8   :  { %v690_v9 = vpop.f32.mrf.mxu1 }
 0x2ba   :  { %v1532_v10 = vpop.f32.mrf.mxu1 }
 0x2e9   :  { %v773_v42 = vpop.permute.xlu1 %772 }
 0x2ea   :  { %v775_v43 = vadd.f32 %v773_v42, %v727_v19 }
 0x2ec   :  { %1581 = vtanh.f32 %v775_v43 }
 0x2f9   :  { %v1582_v50 = vpop.eup %1581 }
 0x2fa   :  { %779 = vrot.lane.b32.xlu1 %v1582_v50, %s1769_s5  ;;  %v896_v50 = vrot.slane %v1932_v54, %v1898_v11 }
 0x2fe   :  { %784 = vrot.lane.b32.xlu1 %v1827_v2, %s1770_s29 }
 0x322   :  { %909 = vadd.xlane.f32.xlu1 %v908_v59 }
 0x36c   :  { %v780_v29 = vpop.permute.xlu1 %779 }
 0x36d   :  { %v782_v4 = vmul.f32 %v780_v29, %v777_v1 }
 0x370   :  { %v785_v3 = vpop.permute.xlu1 %784 }
 0x371   :  { %v787_v5 = vmul.f32 %v1907_v30, %v785_v3 }
 0x373   :  { %v788_v6 = vadd.f32 %v787_v5, %v782_v4  ;;  %v1965_v4 = vld [vmem:[#allocation12 + $0x10] sm:$0xff]  ;;  %v691_v5 = vadd.f32 %v690_v9, %v1880_v35  ;;  %v1146_v35 = vld [vmem:[#allocation11 + $0xf0] sm:$0xff]  ;;  %v1145_v9 = vld [vmem:[#allocation11 + $0xe8] sm:$0xff] }
 0x374   :  { %v1075_v54 = vrot.slane %v1965_v4, %v1872_v28  ;;  %v962_v28 = vld [vmem:[#allocation11 + $0x60] sm:$0xff] }
 0x375   :  { %794 = vrot.lane.b32.xlu0 %v788_v6, %s1769_s5 }
 0x376   :  { %v1970_v6 = vadd.f32 %v1075_v54, %v691_v5 }
 0x378   :  { %v1081_v7 = vmul.f32 %v1970_v6, %v1970_v6 }
 0x394   :  { %914 = vadd.xlane.f32.xlu0 %v913_v8  ;;  %v1082_v8 = vsel %vm700_vm1, %v1081_v7, 0.0 }
 0x3ab   :  { %v910_v13 = vpop.xlane.xlu1 %909 }
 0x3ac   :  { %v911_v14 = vmul.f32 0.010416667, %v910_v13 }
 0x3ae   :  { %v917_v17 = vmul.f32 %v911_v14, %v911_v14  ;;  %v920_v22 = vsub.f32 %v907_v58, %v911_v14 }
 0x3e7   :  { %v1945_v12 = vpop.permute.xlu0 %794 }
 0x3e8   :  { %1542 = vmatmul.mubr.msk.f32.vlgmr.msra.gmra.mxu0 %vm796_vm2, %v1945_v12 }
 0x3e9   :  { %1222 = vmatprep.mubr.f32.mxu0 %v1766_v0 }
 0x41d   :  { %v915_v15 = vpop.xlane.xlu0 %914 }
 0x41e   :  { %v916_v18 = vmul.f32 0.010416667, %v915_v15  ;;  %v963_v15 = vld [vmem:[#allocation11 + $0x70] sm:$0xff] }
 0x41f   :  { %1545 = vmatpush3.msra.mxu1 %v963_v15 }
 0x420   :  { %v918_v19 = vsub.f32 %v916_v18, %v917_v17  ;;  %v1147_v17 = vld [vmem:[#allocation11 + $0xf8] sm:$0xff]  ;;  %v1144_v18 = vld [vmem:[#allocation11 + $0xe0] sm:$0xff]  ;;  %1546 = vmatprep.subr.mxu1 %v1766_v0 }
 0x421   :  { %1182 = vmatprep.subr.mxu0 %v1147_v17  ;;  %1547 = vmatpush3.msra.mxu1 %v962_v28  ;;  %v1065_v28 = vrot.slane %v1965_v4, %v1898_v11 }
 0x422   :  { %v919_v20 = vmax.f32 %v918_v19, 0.0  ;;  %1183 = vmatpush1.msra.mxu0 %v1146_v35  ;;  %v961_v19 = vld [vmem:[#allocation11 + $0x50] sm:$0xff]  ;;  %1548 = vmatprep.subr.mxu1 %v1766_v0 }
 0x423   :  { %1184 = vmatprep.subr.mxu0 %v1145_v9  ;;  %1549 = vmatpush3.msra.mxu1 %v961_v19 }
 0x424   :  { %v921_v21 = vadd.f32 1e-05, %v919_v20  ;;  %v1143_v20 = vld [vmem:[#allocation11 + $0xd8] sm:$0xff]  ;;  %1185 = vmatpush1.msra.mxu0 %v1144_v18  ;;  %1550 = vmatprep.subr.mxu1 %v1766_v0  ;;  %v1070_v18 = vrot.slane %v1965_v4, %v1903_v16  ;;  %v1153_v16 = vld [vmem:[#allocation11 + $0x128] sm:$0xff] }
 0x425   :  { %1186 = vmatprep.subr.mxu0 %v1143_v20 }
 0x426   :  { %1583 = vrsqrt.f32 %v921_v21  ;;  %v1142_v21 = vld [vmem:[#allocation11 + $0xd0] sm:$0xff] }
 0x427   :  { %1187 = vmatpush1.msra.mxu0 %v1142_v21 }
 0x433   :  { %v1584_v30 = vpop.eup %1583 }
 0x434   :  { %v923_v31 = vmul.f32 %v1584_v30, %v920_v22  ;;  %v960_v22 = vld [vmem:[#allocation11 + $0x40] sm:$0xff] }
 0x435   :  { %v1140_v30 = vld [vmem:[#allocation11 + $0xc0] sm:$0xff]  ;;  %1551 = vmatpush3.msra.mxu1 %v960_v22 }
 0x436   :  { %v928_v23 = vmul.f32 %v927_v25, %v923_v31  ;;  %v1141_v25 = vld [vmem:[#allocation11 + $0xc8] sm:$0xff]  ;;  %v1139_v31 = vld [vmem:[#allocation11 + $0xb8] sm:$0xff] }
 0x437   :  { %1188 = vmatprep.subr.mxu0 %v1141_v25  ;;  %1253 = vmatprep.subr.mxu1 %v1139_v31 }
 0x438   :  { %v933_v33 = vadd.f32 %v932_v32, %v928_v23  ;;  %1189 = vmatpush1.msra.mxu0 %v1140_v30 }
 0x43a   :  { %942 = vrot.lane.b32.xlu1 %v933_v33, %s1768_s4 }
 0x4a8   :  { %v865_v36 = vpop.f32.mrf.mxu0 }
 0x4a9   :  { %v869_v37 = vadd.f32 %v865_v36, %v620_v27  ;;  %v1077_v36 = vsel %vm700_vm1, %v1970_v6, 0.0 }
 0x4aa   :  { %v1543_v38 = vpop.f32.mrf.mxu0 }
 0x4ab   :  { %v876_v39 = vadd.f32 %v875_v34, %v869_v37  ;;  %v1138_v37 = vld [vmem:[#allocation11 + $0xb0] sm:$0xff] }
 0x4ac   :  { %v943_v1 = vpop.permute.xlu1 %942 }
 0x4ad   :  { %v877_v40 = vsel %vm700_vm1, %v876_v39, 0.0  ;;  %v881_v41 = vmul.f32 %v876_v39, %v876_v39 }
 0x4ae   :  { %878 = vadd.xlane.f32.xlu0 %v877_v40  ;;  %v1136_v40 = vld [vmem:[#allocation11 + $0xa0] sm:$0xff] }
 0x4af   :  { %v882_v42 = vsel %vm700_vm1, %v881_v41, 0.0  ;;  %v1135_v41 = vld [vmem:[#allocation11 + $0x98] sm:$0xff] }
 0x4b2   :  { %883 = vadd.xlane.f32.xlu0 %v882_v42  ;;  %v1133_v42 = vld [vmem:[#allocation11 + $0x88] sm:$0xff] }
 0x537   :  { %v879_v43 = vpop.xlane.xlu0 %878 }
 0x538   :  { %v880_v44 = vmul.f32 0.010416667, %v879_v43  ;;  %v1132_v43 = vld [vmem:[#allocation11 + $0x80] sm:$0xff] }
 0x53a   :  { %v886_v46 = vmul.f32 %v880_v44, %v880_v44  ;;  %v889_v52 = vsub.f32 %v876_v39, %v880_v44  ;;  %v1137_v39 = vld [vmem:[#allocation11 + $0xa8] sm:$0xff] }
 0x53b   :  { %v884_v45 = vpop.xlane.xlu0 %883 }
 0x53c   :  { %v885_v47 = vmul.f32 0.010416667, %v884_v45 }
 0x53e   :  { %v887_v24 = vsub.f32 %v885_v47, %v886_v46 }
 0x540   :  { %v888_v48 = vmax.f32 %v887_v24, 0.0 }
 0x542   :  { %v890_v49 = vadd.f32 1e-05, %v888_v48 }
 0x544   :  { %1585 = vrsqrt.f32 %v890_v49 }
 0x551   :  { %v1586_v53 = vpop.eup %1585 }
 0x552   :  { %v892_v51 = vmul.f32 %v1586_v53, %v889_v52  ;;  %v1096_v52 = vrot.slane %v1965_v4, %v1887_v56 }
 0x554   :  { %v897_v58 = vmul.f32 %v896_v50, %v892_v51  ;;  %v1101_v51 = vrot.slane %v1965_v4, %v1890_v57 }
 0x556   :  { %v902_v59 = vadd.f32 %v901_v55, %v897_v58 }
 0x558   :  { %v934_v60 = vadd.f32 %v933_v33, %v902_v59 }
 0x55a   :  { %v1413_v61 = vmul.f32 -1.442695, %v934_v60 }
 0x55c   :  { %1587 = vpow2.f32 %v1413_v61 }
 0x569   :  { %v1588_v62 = vpop.eup %1587 }
 0x56a   :  { %v938_v63 = vadd.f32 1.0, %v1588_v62 }
 0x56c   :  { %1589 = vrcp.f32 %v938_v63 }
 0x579   :  { %v1590_v29 = vpop.eup %1589 }
 0x57a   :  { %v945_v3 = vmul.f32 %v1590_v29, %v943_v1  ;;  %v952_v32 = vsub.f32 1.0, %v1590_v29  ;;  %v958_v33 = vmul.f32 %v1590_v29, %v1827_v2  ;;  %v1134_v2 = vld [vmem:[#allocation11 + $0x90] sm:$0xff] }
 0x57c   :  { %947 = vrot.lane.b32.xlu0 %v945_v3, %s1768_s4 }
 0x59b   :  { %1083 = vadd.xlane.f32.xlu0 %v1082_v8 }
 0x5ee   :  { %v948_v10 = vpop.permute.xlu0 %947 }
 0x5ef   :  { %v950_v13 = vadd.f32 %v948_v10, %v902_v59  ;;  %v1044_v59 = vrot.slane %v1965_v4, %v1867_v26  ;;  %v1152_v4 = vld [vmem:[#allocation11 + $0x120] sm:$0xff] }
 0x5f1   :  { %1591 = vtanh.f32 %v950_v13 }
 0x5fe   :  { %v1592_v14 = vpop.eup %1591 }
 0x5ff   :  { %954 = vrot.lane.b32.xlu1 %v1592_v14, %s1769_s5 }
 0x624   :  { %v1084_v44 = vpop.xlane.xlu0 %1083 }
 0x625   :  { %v1085_v47 = vmul.f32 0.010416667, %v1084_v44 }
 0x671   :  { %v955_v23 = vpop.permute.xlu1 %954 }
 0x672   :  { %v957_v27 = vmul.f32 %v955_v23, %v952_v32 }
 0x674   :  { %v959_v34 = vadd.f32 %v958_v33, %v957_v27 }
 0x676   :  { %965 = vrot.lane.b32.xlu1 %v959_v34, %s1769_s5  ;;  %v1155_v34 = vld [vmem:[#allocation11 + $0x138] sm:$0xff] }
 0x677   :  { %1329 = vmatprep.subr.mxu0 %v1155_v34 }
 0x69a   :  { %1078 = vadd.xlane.f32.xlu1 %v1077_v36  ;;  %v1154_v36 = vld [vmem:[#allocation11 + $0x130] sm:$0xff] }
 0x6e8   :  { %v966_v38 = vpop.permute.xlu1 %965 }
 0x6e9   :  { %1553 = vmatmul.mubr.msk.f32.vlgmr.msra.gmra.mxu1 %vm796_vm2, %v966_v38  ;;  %1416 = vmatmul.mubr.msk.f32.vlgmr.msra.gmra.mxu0 %vm796_vm2, %v966_v38  ;;  %v1150_v38 = vld [vmem:[#allocation11 + $0x110] sm:$0xff] }
 0x6ea   :  { %1254 = vmatpush1.msra.mxu1 %v1138_v37  ;;  %1293 = vmatprep.mubr.f32.mxu1 %v1766_v0  ;;  %v1151_v37 = vld [vmem:[#allocation11 + $0x118] sm:$0xff] }
 0x6eb   :  { %1255 = vmatprep.subr.mxu1 %v1137_v39  ;;  %1369 = vmatprep.mubr.f32.mxu0 %v1766_v0 }
 0x6ec   :  { %1256 = vmatpush1.msra.mxu1 %v1136_v40  ;;  %1330 = vmatpush1.msra.mxu0 %v1154_v36  ;;  %v1149_v40 = vld [vmem:[#allocation11 + $0x108] sm:$0xff] }
 0x6ed   :  { %1257 = vmatprep.subr.mxu1 %v1135_v41  ;;  %1331 = vmatprep.subr.mxu0 %v1153_v16  ;;  %v1148_v41 = vld [vmem:[#allocation11 + $0x100] sm:$0xff] }
 0x6ee   :  { %1258 = vmatpush1.msra.mxu1 %v1134_v2  ;;  %1332 = vmatpush1.msra.mxu0 %v1152_v4  ;;  %v1603_v2 = vld [vmem:[#allocation6] sm:$0xff] }
 0x6ef   :  { %1259 = vmatprep.subr.mxu1 %v1133_v42  ;;  %1333 = vmatprep.subr.mxu0 %v1151_v37 }
 0x6f0   :  { %1260 = vmatpush1.msra.mxu1 %v1132_v43  ;;  %1334 = vmatpush1.msra.mxu0 %v1150_v38 }
 0x6f1   :  { %1417 = vmatmul.mubr.msk.f32.vlgmr.msra.gmra.mxu1 %vm796_vm2, %v1945_v12  ;;  %1335 = vmatprep.subr.mxu0 %v1149_v40 }
 0x6f2   :  { %1336 = vmatpush1.msra.mxu0 %v1148_v41 }
 0x723   :  { %v1079_v45 = vpop.xlane.xlu1 %1078 }
 0x724   :  { %v1080_v46 = vmul.f32 0.010416667, %v1079_v45 }
 0x726   :  { %v1086_v24 = vmul.f32 %v1080_v46, %v1080_v46  ;;  %v1089_v0 = vsub.f32 %v1970_v6, %v1080_v46 }
 0x728   :  { %v1087_v48 = vsub.f32 %v1085_v47, %v1086_v24 }
 0x72a   :  { %v1088_v49 = vmax.f32 %v1087_v48, 0.0  ;;  %v1157_v48 = vld [vmem:[#allocation11 + $0x140] ss:$8 sm:$0x3] }
 0x72c   :  { %v1090_v50 = vadd.f32 1e-05, %v1088_v49  ;;  %v1382_v49 = vrot.slane %v1157_v48, %v1867_v26 }
 0x72e   :  { %1593 = vrsqrt.f32 %v1090_v50 }
 0x73b   :  { %v1594_v53 = vpop.eup %1593 }
 0x73c   :  { %v1092_v55 = vmul.f32 %v1594_v53, %v1089_v0 }
 0x73e   :  { %v1097_v12 = vmul.f32 %v1096_v52, %v1092_v55 }
 0x740   :  { %v1102_v58 = vadd.f32 %v1101_v51, %v1097_v12 }
 0x742   :  { %1111 = vrot.lane.b32.xlu1 %v1102_v58, %s1768_s4 }
 0x7a9   :  { %v1035_v60 = vpop.f32.mrf.mxu1  ;;  %v1224_v61 = vpop.f32.mrf.mxu0 }
 0x7aa   :  { %v1045_v62 = vadd.f32 %v1044_v59, %v1035_v60 }
 0x7ab   :  { %v1554_v63 = vpop.f32.mrf.mxu1  ;;  %v1226_v29 = vpop.f32.mrf.mxu0 }
 0x7ac   :  { %v1046_v1 = vsel %vm700_vm1, %v1045_v62, 0.0  ;;  %v1050_v56 = vmul.f32 %v1045_v62, %v1045_v62 }
 0x7ad   :  { %1047 = vadd.xlane.f32.xlu0 %v1046_v1 }
 0x7ae   :  { %v1051_v3 = vsel %vm700_vm1, %v1050_v56, 0.0 }
 0x7b1   :  { %v1295_v5 = vpop.f32.mrf.mxu1  ;;  %1052 = vadd.xlane.f32.xlu0 %v1051_v3 }
 0x7b2   :  { %v1999_v57 = vadd.f32 %v1295_v5, %v1224_v61 }
 0x7b3   :  { %v1297_v54 = vpop.f32.mrf.mxu1 }
 0x7b4   :  { %v1112_v23 = vpop.permute.xlu1 %1111 }
 0x836   :  { %v1048_v6 = vpop.xlane.xlu0 %1047 }
 0x837   :  { %v1049_v7 = vmul.f32 0.010416667, %v1048_v6 }
 0x839   :  { %v1055_v10 = vmul.f32 %v1049_v7, %v1049_v7  ;;  %v1058_v35 = vsub.f32 %v1045_v62, %v1049_v7 }
 0x83a   :  { %v1053_v8 = vpop.xlane.xlu0 %1052 }
 0x83b   :  { %v1054_v13 = vmul.f32 0.010416667, %v1053_v8 }
 0x83d   :  { %v1056_v14 = vsub.f32 %v1054_v13, %v1055_v10 }
 0x83f   :  { %v1057_v15 = vmax.f32 %v1056_v14, 0.0 }
 0x841   :  { %v1059_v17 = vadd.f32 1e-05, %v1057_v15 }
 0x843   :  { %1595 = vrsqrt.f32 %v1059_v17 }
 0x850   :  { %v1596_v9 = vpop.eup %1595 }
 0x851   :  { %v1061_v19 = vmul.f32 %v1596_v9, %v1058_v35 }
 0x853   :  { %v1066_v20 = vmul.f32 %v1065_v28, %v1061_v19 }
 0x855   :  { %v1071_v21 = vadd.f32 %v1070_v18, %v1066_v20 }
 0x857   :  { %v1103_v22 = vadd.f32 %v1102_v58, %v1071_v21 }
 0x859   :  { %v1415_v25 = vmul.f32 -1.442695, %v1103_v22 }
 0x85b   :  { %1597 = vpow2.f32 %v1415_v25 }
 0x868   :  { %v1598_v30 = vpop.eup %1597 }
 0x869   :  { %v1107_v31 = vadd.f32 1.0, %v1598_v30 }
 0x86b   :  { %1599 = vrcp.f32 %v1107_v31 }
 0x878   :  { %v1600_v32 = vpop.eup %1599 }
 0x879   :  { %v1114_v33 = vmul.f32 %v1600_v32, %v1112_v23  ;;  %v1121_v43 = vsub.f32 1.0, %v1600_v32 }
 0x87b   :  { %1116 = vrot.lane.b32.xlu0 %v1114_v33, %s1768_s4 }
 0x8ed   :  { %v1117_v27 = vpop.permute.xlu0 %1116 }
 0x8ee   :  { %v1119_v11 = vadd.f32 %v1117_v27, %v1071_v21 }
 0x8f0   :  { %1601 = vtanh.f32 %v1119_v11 }
 0x8fd   :  { %v1602_v39 = vpop.eup %1601 }
 0x8fe   :  { %1123 = vrot.lane.b32.xlu1 %v1602_v39, %s1769_s5 }
 0x902   :  { %1127 = vrot.lane.b32.xlu1 %v1603_v2, %s1769_s5 }
 0x970   :  { %v1124_v42 = vpop.permute.xlu1 %1123 }
 0x971   :  { %v1126_v45 = vmul.f32 %v1124_v42, %v1121_v43 }
 0x974   :  { %v1128_v44 = vpop.permute.xlu1 %1127 }
 0x975   :  { %v1130_v46 = vmul.f32 %v1600_v32, %v1128_v44 }
 0x977   :  { %v1131_v47 = vadd.f32 %v1130_v46, %v1126_v45 }
 0x979   :  { %1301 = vrot.lane.b32.xlu1 %v1131_v47, %s1769_s5 }
 0x9eb   :  { %v1302_v24 = vpop.permute.xlu1 %1301 }
 0x9ec   :  { %1418 = vmatmul.mubr.msk.f32.vlgmr.msra.gmra.mxu0 %vm796_vm2, %v1302_v24 }
 0xaac   :  { %v1371_v50 = vpop.f32.mrf.mxu0 }
 0xaad   :  { %v1376_v0 = vadd.f32 %v1371_v50, %v1999_v57 }
 0xaae   :  { %v1373_v52 = vpop.f32.mrf.mxu0 }
 0xaaf   :  { %v1389_v53 = vadd.f32 %v1382_v49, %v1376_v0 }
 0xab1   :  { %1391 = vst [vmem:[#allocation14] sm:$0xff] %v1389_v53 }
 0xab2   :  { %1735 = shalt.err (!%p1732_p6)
}
 0xab3   :  { %1402 = dma.vmem_to_hbm [thread:$0]  %s1400_s7, 128, %s2021_s6, [#allocation5]  }
 0xab4   :  { %1752 = dma.done.wait [#allocation5], 128  }
 0xab5   :  { %1753 = vsyncadd [#allocation5], 4294967168 }
 0xab6   :  { %1406 = vsyncpa [#allocation4], 1 }
 0xab7   :  { %1407 = vsyncpa [#allocation7], 1 }
 0xab8   :  { %1408 = vsyncpa [#allocation10], 1 }
 0xab9   :  { %1409 = vsyncpa [#allocation13], 1 }
 0xaba   :  { %1410 = vsyncpa [#allocation5], 1 }

</bundles_post_ra>
